<compile_context>
chip_gen: v7x
topology: tpu7x:2x2x1
jax: 0.10.0
libtpu: 0.0.40
codegen_flags: <defaults>
</compile_context>

<pallas_src>
import functools

import jax
import jax.numpy as jnp
from jax.experimental import pallas as pl
from jax.experimental.pallas import tpu as pltpu


def _round_up(n, m):
    return ((n + m - 1) // m) * m


def pack_params(params, matmul_dtype=jnp.bfloat16):
    """One-time weight packing / padding (call at load time, NOT per forward).

    Returns (packed_arrays_dict, output_size)."""
    w_ih, w_hh = params["w_ih"], params["w_hh"]
    b_ih, b_hh = params["b_ih"], params["b_hh"]
    w_out, b_out = params["w_out"], params["b_out"]

    I = w_ih.shape[1]
    H = w_hh.shape[1]
    O = w_out.shape[0]
    IP = _round_up(I, 128)
    HP = _round_up(H, 128)
    OP = _round_up(O, 128)
    f32 = jnp.float32

    def pack_gate_weight(w, k, kp):
        # w: (4H, k) PyTorch layout -> transposed (kp, 4*HP), per-gate HP blocks
        out = jnp.zeros((kp, 4 * HP), matmul_dtype)
        for g in range(4):
            out = out.at[:k, g * HP:g * HP + H].set(
                w[g * H:(g + 1) * H, :].T.astype(matmul_dtype))
        return out

    wih_p = pack_gate_weight(w_ih, I, IP)            # (IP, 4HP)
    whh_p = pack_gate_weight(w_hh, H, HP)            # (HP, 4HP)

    bias = b_ih + b_hh
    b_p = jnp.zeros((1, 4 * HP), f32)
    for g in range(4):
        b_p = b_p.at[0, g * HP:g * HP + H].set(bias[g * H:(g + 1) * H])

    wout_p = jnp.zeros((HP, OP), matmul_dtype).at[:H, :O].set(
        w_out.T.astype(matmul_dtype))
    bout_p = jnp.zeros((1, OP), f32).at[0, :O].set(b_out)

    packed = {"wih": wih_p, "whh": whh_p, "b": b_p, "wout": wout_p,
              "bout": bout_p}
    return packed, O


def lstm_model_forward(x, packed, out_size, matmul_dtype=jnp.bfloat16):
    """x: (B, S, I) float32 (batch_first, like PyTorch). Returns (B, S, O) f32."""
    B, S, I = x.shape
    IP = packed["wih"].shape[0]
    HP = packed["whh"].shape[0]
    OP = packed["wout"].shape[1]
    B_pad = _round_up(max(B, 1), 8)                  # f32 sublane multiple
    f32 = jnp.float32

    # -------- per-call glue: only x layout + zero padding (exact) ------------
    # time-major (S, B_pad, IP) -> flattened (S*B_pad, IP); padded batch rows
    # carry x = 0 (their garbage h never mixes across rows; sliced off below).
    x_tm = jnp.transpose(x, (1, 0, 2))               # (S, B, I)
    x_p = jnp.zeros((S, B_pad, IP), matmul_dtype)
    x_p = x_p.at[:, :B, :I].set(x_tm.astype(matmul_dtype))
    x_p = x_p.reshape(S * B_pad, IP)

    # Explicit VMEM budget (defaults: 16 MiB v5e, 32 MiB v6e/v7x scoped).
    est = (S * B_pad * IP * 2                         # x (bf16)
           + IP * 4 * HP * 2 + HP * 4 * HP * 2        # W_ih, W_hh (bf16)
           + 4 * HP * 4 + HP * OP * 2 + OP * 4        # biases, W_out
           + S * B_pad * OP * 4                       # y out (f32)
           + S * B_pad * 4 * HP * 4                   # xg scratch (f32)
           + S * B_pad * HP * 4)                      # hs scratch (f32)
    vmem_limit = int(min(max(2 * est + (4 << 20), 16 << 20), 64 << 20))

    # -------- kernel ----------------------------------------------------------
    def kernel(x_ref, wih_ref, whh_ref, b_ref, wout_ref, bout_ref, y_ref,
               xg_sc, hs_sc):
        # Prologue: input projection for ALL timesteps in one MXU pass; bias
        # added once here (hoisted off the serial chain and out of the loop).
        xg_sc[...] = (
            jnp.dot(x_ref[...], wih_ref[...], preferred_element_type=f32)
            + b_ref[...])

        # Serial recurrence: exactly one (B_pad,HP)@(HP,4HP) matmul + f32
        # elementwise gate math per step; h/c carried in vregs.  Every
        # per-step scratch access is 8-sublane aligned and full-lane wide.
        def step(t, carry):
            h, c = carry
            row = pl.multiple_of(t * B_pad, B_pad)        # B_pad == 8-aligned
            xg_t = xg_sc[pl.ds(row, B_pad), :]            # (B_pad, 4HP)
            gates = xg_t + jnp.dot(h.astype(matmul_dtype), whh_ref[...],
                                   preferred_element_type=f32)
            i_g = jax.nn.sigmoid(gates[:, 0 * HP:1 * HP])
            f_g = jax.nn.sigmoid(gates[:, 1 * HP:2 * HP])
            g_g = jnp.tanh(gates[:, 2 * HP:3 * HP])
            o_g = jax.nn.sigmoid(gates[:, 3 * HP:4 * HP])
            c_new = f_g * c + i_g * g_g
            h_new = o_g * jnp.tanh(c_new)
            hs_sc[t] = h_new                              # whole-tile store
            return h_new, c_new

        h0 = jnp.zeros((B_pad, HP), f32)
        c0 = jnp.zeros((B_pad, HP), f32)
        unroll = True if S <= 32 else 8                   # cap unroll blowup
        jax.lax.fori_loop(0, S, step, (h0, c0), unroll=unroll)

        # Epilogue (off the recurrent critical path): ONE big-M output
        # projection over all timesteps + clamp(0,100), then a single
        # lane-dense (OP = multiple of 128) unmasked slab store.
        h_all = hs_sc[...].reshape(S * B_pad, HP).astype(matmul_dtype)
        y = (jnp.dot(h_all, wout_ref[...], preferred_element_type=f32)
             + bout_ref[...])
        y_ref[...] = jnp.clip(y, 0.0, 100.0)

    y_p = pl.pallas_call(
        kernel,
        out_shape=jax.ShapeDtypeStruct((S * B_pad, OP), f32),
        grid_spec=pltpu.PrefetchScalarGridSpec(
            num_scalar_prefetch=0,
            grid=(1,),                                     # single invocation
            in_specs=[
                pl.BlockSpec((S * B_pad, IP), lambda i: (0, 0)),   # x, all t
                pl.BlockSpec((IP, 4 * HP), lambda i: (0, 0)),      # W_ih^T
                pl.BlockSpec((HP, 4 * HP), lambda i: (0, 0)),      # W_hh^T
                pl.BlockSpec((1, 4 * HP), lambda i: (0, 0)),       # b_ih+b_hh
                pl.BlockSpec((HP, OP), lambda i: (0, 0)),          # W_out^T
                pl.BlockSpec((1, OP), lambda i: (0, 0)),           # b_out
            ],
            out_specs=pl.BlockSpec((S * B_pad, OP), lambda i: (0, 0)),
            scratch_shapes=[
                pltpu.VMEM((S * B_pad, 4 * HP), f32),   # precomputed x-gates
                pltpu.VMEM((S, B_pad, HP), f32),        # all hidden states
            ],
        ),
        compiler_params=pltpu.CompilerParams(
            dimension_semantics=("arbitrary",),
            vmem_limit_bytes=vmem_limit),
    )(x_p, packed["wih"], packed["whh"], packed["b"], packed["wout"],
      packed["bout"])

    # Un-pad batch/output lanes and return batch-first (B, S, O).
    y = y_p.reshape(S, B_pad, OP)[:, :B, :out_size]
    return jnp.transpose(y, (1, 0, 2))


def _reference_forward(x, params, matmul_dtype=jnp.float32):
    """Pure-JAX reference of the PyTorch forward pass. With
    matmul_dtype=bfloat16 it mirrors the kernel's MXU operand precision
    (bf16 operands, f32 accumulation, f32 elementwise)."""
    w_ih, w_hh, b_ih, b_hh, w_out, b_out = (
        params["w_ih"], params["w_hh"], params["b_ih"], params["b_hh"],
        params["w_out"], params["b_out"])
    B, S, I = x.shape
    H = w_hh.shape[1]

    wih_t = w_ih.T.astype(matmul_dtype)
    whh_t = w_hh.T.astype(matmul_dtype)
    wout_t = w_out.T.astype(matmul_dtype)
    b = (b_ih + b_hh)[None, :]

    def step(carry, x_t):
        h, c = carry
        gates = (jnp.dot(x_t.astype(matmul_dtype), wih_t,
                         preferred_element_type=jnp.float32)
                 + jnp.dot(h.astype(matmul_dtype), whh_t,
                           preferred_element_type=jnp.float32)
                 + b)
        i = jax.nn.sigmoid(gates[:, 0 * H:1 * H])
        f = jax.nn.sigmoid(gates[:, 1 * H:2 * H])
        g = jnp.tanh(gates[:, 2 * H:3 * H])
        o = jax.nn.sigmoid(gates[:, 3 * H:4 * H])
        c = f * c + i * g
        h = o * jnp.tanh(c)
        return (h, c), h

    h0 = jnp.zeros((B, H), jnp.float32)
    c0 = jnp.zeros((B, H), jnp.float32)
    _, hs = jax.lax.scan(step, (h0, c0), jnp.transpose(x, (1, 0, 2)))
    hs = jnp.transpose(hs, (1, 0, 2))                 # (B, S, H)
    y = jnp.dot(hs.astype(matmul_dtype), wout_t,
                preferred_element_type=jnp.float32) + b_out
    return jnp.clip(y, 0.0, 100.0)


def init_params(key, input_size, hidden_size, output_size):
    """Deterministic init mimicking PyTorch's U(-1/sqrt(H), 1/sqrt(H))."""
    k = 1.0 / jnp.sqrt(jnp.float32(hidden_size))
    keys = jax.random.split(key, 6)
    u = lambda kk, shape: jax.random.uniform(kk, shape, jnp.float32, -k, k)
    return {
        "w_ih": u(keys[0], (4 * hidden_size, input_size)),
        "w_hh": u(keys[1], (4 * hidden_size, hidden_size)),
        "b_ih": u(keys[2], (4 * hidden_size,)),
        "b_hh": u(keys[3], (4 * hidden_size,)),
        "w_out": u(keys[4], (output_size, hidden_size)),
        "b_out": u(keys[5], (output_size,)),
    }


if __name__ == "__main__":
    B, S, I, H, O = 2, 8, 8, 32, 4

    key = jax.random.PRNGKey(0)
    k_x, k_p = jax.random.split(key)
    x = jax.random.normal(k_x, (B, S, I), jnp.float32)
    params = init_params(k_p, I, H, O)

    # One-time weight packing (hoisted out of the per-call forward).
    packed, out_size = pack_params(params)
    fwd = jax.jit(functools.partial(lstm_model_forward, out_size=out_size))

    y = jax.block_until_ready(fwd(x, packed))
    assert y.shape == (B, S, O)

    # Matched-precision reference (same bf16 matmul operands, f32 accumulate).
    y_ref_bf16 = jax.block_until_ready(_reference_forward(x, params, jnp.bfloat16))
    assert jnp.allclose(y, y_ref_bf16, atol=2e-3, rtol=2e-3), "mismatch vs bf16 ref"

    # Full-f32 PyTorch-semantics reference (loose tol due to bf16 matmul operands).
    y_ref_f32 = jax.block_until_ready(_reference_forward(x, params, jnp.float32))
    assert jnp.allclose(y, y_ref_f32, atol=1e-1, rtol=1e-1), "mismatch vs f32 ref"

    print("KERNEL_OK")
</pallas_src>

<mosaic_0001>
module attributes {stable_mosaic.version = 11 : i64} {
  func.func @kernel(%arg0: i32, %arg1: memref<64x128xbf16, #tpu.memory_space<vmem>>, %arg2: memref<128x512xbf16, #tpu.memory_space<vmem>>, %arg3: memref<128x512xbf16, #tpu.memory_space<vmem>>, %arg4: memref<1x512xf32, #tpu.memory_space<vmem>>, %arg5: memref<128x128xbf16, #tpu.memory_space<vmem>>, %arg6: memref<1x128xf32, #tpu.memory_space<vmem>>, %arg7: memref<64x128xf32, #tpu.memory_space<vmem>>, %arg8: memref<64x512xf32, #tpu.memory_space<vmem>>, %arg9: memref<8x8x128xf32, #tpu.memory_space<vmem>>) attributes {dimension_semantics = [#tpu.dimension_semantics<arbitrary>], iteration_bounds = array<i64: 1>, scalar_prefetch = 0 : i64, scratch_operands = 2 : i64, tpu.core_type = #tpu.core_type<tc>, window_params = [{pipeline_mode = #tpu.pipeline_mode<synchronous>, transform_indices = @transform_0, window_bounds = array<i64: 64, 128>}, {pipeline_mode = #tpu.pipeline_mode<synchronous>, transform_indices = @transform_1, window_bounds = array<i64: 128, 512>}, {pipeline_mode = #tpu.pipeline_mode<synchronous>, transform_indices = @transform_2, window_bounds = array<i64: 128, 512>}, {pipeline_mode = #tpu.pipeline_mode<synchronous>, transform_indices = @transform_3, window_bounds = array<i64: 1, 512>}, {pipeline_mode = #tpu.pipeline_mode<synchronous>, transform_indices = @transform_4, window_bounds = array<i64: 128, 128>}, {pipeline_mode = #tpu.pipeline_mode<synchronous>, transform_indices = @transform_5, window_bounds = array<i64: 1, 128>}, {pipeline_mode = #tpu.pipeline_mode<synchronous>, transform_indices = @transform_6, window_bounds = array<i64: 64, 128>}]} {
    %c0 = arith.constant 0 : index
    %c0_0 = arith.constant 0 : index
    %0 = vector.load %arg1[%c0, %c0_0] : memref<64x128xbf16, #tpu.memory_space<vmem>>, vector<64x128xbf16>
    %c0_1 = arith.constant 0 : index
    %c0_2 = arith.constant 0 : index
    %1 = vector.load %arg2[%c0_1, %c0_2] : memref<128x512xbf16, #tpu.memory_space<vmem>>, vector<128x512xbf16>
    %cst = arith.constant dense<0.000000e+00> : vector<64x512xf32>
    %2 = tpu.matmul %0, %1, %cst {dimension_numbers = #tpu.dot_dimension_numbers<[1], [0], [0], [1], [0, 0, 1, 1], [], []>} : vector<64x128xbf16>, vector<128x512xbf16>, vector<64x512xf32> -> vector<64x512xf32>
    %c0_3 = arith.constant 0 : index
    %c0_4 = arith.constant 0 : index
    %3 = vector.load %arg4[%c0_3, %c0_4] : memref<1x512xf32, #tpu.memory_space<vmem>>, vector<1x512xf32>
    %4 = vector.broadcast %3 : vector<1x512xf32> to vector<64x512xf32>
    %5 = arith.addf %2, %4 : vector<64x512xf32>
    %c0_5 = arith.constant 0 : index
    %c0_6 = arith.constant 0 : index
    %6 = vector.load %arg8[%c0_5, %c0_6] : memref<64x512xf32, #tpu.memory_space<vmem>>, vector<64x512xf32>
    tpu.vector_store %arg8[%c0_5, %c0_6], %5 {strides = array<i32>} : memref<64x512xf32, #tpu.memory_space<vmem>>, vector<64x512xf32>,
    %cst_7 = arith.constant 0.000000e+00 : f32
    %7 = vector.broadcast %cst_7 : f32 to vector<8x128xf32>
    %cst_8 = arith.constant 0.000000e+00 : f32
    %8 = vector.broadcast %cst_8 : f32 to vector<8x128xf32>
    %c0_i32 = arith.constant 0 : i32
    %c8_i32 = arith.constant 8 : i32
    %9 = arith.muli %c0_i32, %c8_i32 : i32
    %10 = tpu.assume_multiple %9, 8 : i32
    %11 = arith.index_cast %10 : i32 to index
    %c0_9 = arith.constant 0 : index
    %12 = vector.load %arg8[%11, %c0_9] : memref<64x512xf32, #tpu.memory_space<vmem>>, vector<8x512xf32>
    %13 = arith.truncf %7 : vector<8x128xf32> to vector<8x128xbf16>
    %c0_10 = arith.constant 0 : index
    %c0_11 = arith.constant 0 : index
    %14 = vector.load %arg3[%c0_10, %c0_11] : memref<128x512xbf16, #tpu.memory_space<vmem>>, vector<128x512xbf16>
    %cst_12 = arith.constant dense<0.000000e+00> : vector<8x512xf32>
    %15 = tpu.matmul %13, %14, %cst_12 {dimension_numbers = #tpu.dot_dimension_numbers<[1], [0], [0], [1], [0, 0, 1, 1], [], []>} : vector<8x128xbf16>, vector<128x512xbf16>, vector<8x512xf32> -> vector<8x512xf32>
    %16 = arith.addf %12, %15 : vector<8x512xf32>
    %17 = vector.extract_strided_slice %16 {offsets = [0, 0], sizes = [8, 128], strides = [1, 1]} : vector<8x512xf32> to vector<8x128xf32>
    %18 = arith.negf %17 : vector<8x128xf32>
    %19 = math.exp %18 : vector<8x128xf32>
    %cst_13 = arith.constant 1.000000e+00 : f32
    %20 = vector.broadcast %cst_13 : f32 to vector<8x128xf32>
    %21 = arith.addf %20, %19 : vector<8x128xf32>
    %22 = arith.divf %20, %21 : vector<8x128xf32>
    %23 = vector.extract_strided_slice %16 {offsets = [0, 128], sizes = [8, 128], strides = [1, 1]} : vector<8x512xf32> to vector<8x128xf32>
    %24 = arith.negf %23 : vector<8x128xf32>
    %25 = math.exp %24 : vector<8x128xf32>
    %cst_14 = arith.constant 1.000000e+00 : f32
    %26 = vector.broadcast %cst_14 : f32 to vector<8x128xf32>
    %27 = arith.addf %26, %25 : vector<8x128xf32>
    %28 = arith.divf %26, %27 : vector<8x128xf32>
    %29 = vector.extract_strided_slice %16 {offsets = [0, 256], sizes = [8, 128], strides = [1, 1]} : vector<8x512xf32> to vector<8x128xf32>
    %30 = math.tanh %29 : vector<8x128xf32>
    %31 = vector.extract_strided_slice %16 {offsets = [0, 384], sizes = [8, 128], strides = [1, 1]} : vector<8x512xf32> to vector<8x128xf32>
    %32 = arith.negf %31 : vector<8x128xf32>
    %33 = math.exp %32 : vector<8x128xf32>
    %cst_15 = arith.constant 1.000000e+00 : f32
    %34 = vector.broadcast %cst_15 : f32 to vector<8x128xf32>
    %35 = arith.addf %34, %33 : vector<8x128xf32>
    %36 = arith.divf %34, %35 : vector<8x128xf32>
    %37 = arith.mulf %28, %8 : vector<8x128xf32>
    %38 = arith.mulf %22, %30 : vector<8x128xf32>
    %39 = arith.addf %37, %38 : vector<8x128xf32>
    %40 = math.tanh %39 : vector<8x128xf32>
    %41 = arith.mulf %36, %40 : vector<8x128xf32>
    %42 = arith.index_cast %c0_i32 : i32 to index
    %c0_16 = arith.constant 0 : index
    %c0_17 = arith.constant 0 : index
    %43 = vector.load %arg9[%42, %c0_16, %c0_17] : memref<8x8x128xf32, #tpu.memory_space<vmem>>, vector<1x8x128xf32>
    %44 = vector.shape_cast %43 : vector<1x8x128xf32> to vector<8x128xf32>
    %45 = vector.shape_cast %41 : vector<8x128xf32> to vector<1x8x128xf32>
    tpu.vector_store %arg9[%42, %c0_16, %c0_17], %45 {strides = array<i32>} : memref<8x8x128xf32, #tpu.memory_space<vmem>>, vector<1x8x128xf32>,
    %c1_i32 = arith.constant 1 : i32
    %c8_i32_18 = arith.constant 8 : i32
    %46 = arith.muli %c1_i32, %c8_i32_18 : i32
    %47 = tpu.assume_multiple %46, 8 : i32
    %48 = arith.index_cast %47 : i32 to index
    %c0_19 = arith.constant 0 : index
    %49 = vector.load %arg8[%48, %c0_19] : memref<64x512xf32, #tpu.memory_space<vmem>>, vector<8x512xf32>
    %50 = arith.truncf %41 : vector<8x128xf32> to vector<8x128xbf16>
    %c0_20 = arith.constant 0 : index
    %c0_21 = arith.constant 0 : index
    %51 = vector.load %arg3[%c0_20, %c0_21] : memref<128x512xbf16, #tpu.memory_space<vmem>>, vector<128x512xbf16>
    %cst_22 = arith.constant dense<0.000000e+00> : vector<8x512xf32>
    %52 = tpu.matmul %50, %51, %cst_22 {dimension_numbers = #tpu.dot_dimension_numbers<[1], [0], [0], [1], [0, 0, 1, 1], [], []>} : vector<8x128xbf16>, vector<128x512xbf16>, vector<8x512xf32> -> vector<8x512xf32>
    %53 = arith.addf %49, %52 : vector<8x512xf32>
    %54 = vector.extract_strided_slice %53 {offsets = [0, 0], sizes = [8, 128], strides = [1, 1]} : vector<8x512xf32> to vector<8x128xf32>
    %55 = arith.negf %54 : vector<8x128xf32>
    %56 = math.exp %55 : vector<8x128xf32>
    %cst_23 = arith.constant 1.000000e+00 : f32
    %57 = vector.broadcast %cst_23 : f32 to vector<8x128xf32>
    %58 = arith.addf %57, %56 : vector<8x128xf32>
    %59 = arith.divf %57, %58 : vector<8x128xf32>
    %60 = vector.extract_strided_slice %53 {offsets = [0, 128], sizes = [8, 128], strides = [1, 1]} : vector<8x512xf32> to vector<8x128xf32>
    %61 = arith.negf %60 : vector<8x128xf32>
    %62 = math.exp %61 : vector<8x128xf32>
    %cst_24 = arith.constant 1.000000e+00 : f32
    %63 = vector.broadcast %cst_24 : f32 to vector<8x128xf32>
    %64 = arith.addf %63, %62 : vector<8x128xf32>
    %65 = arith.divf %63, %64 : vector<8x128xf32>
    %66 = vector.extract_strided_slice %53 {offsets = [0, 256], sizes = [8, 128], strides = [1, 1]} : vector<8x512xf32> to vector<8x128xf32>
    %67 = math.tanh %66 : vector<8x128xf32>
    %68 = vector.extract_strided_slice %53 {offsets = [0, 384], sizes = [8, 128], strides = [1, 1]} : vector<8x512xf32> to vector<8x128xf32>
    %69 = arith.negf %68 : vector<8x128xf32>
    %70 = math.exp %69 : vector<8x128xf32>
    %cst_25 = arith.constant 1.000000e+00 : f32
    %71 = vector.broadcast %cst_25 : f32 to vector<8x128xf32>
    %72 = arith.addf %71, %70 : vector<8x128xf32>
    %73 = arith.divf %71, %72 : vector<8x128xf32>
    %74 = arith.mulf %65, %39 : vector<8x128xf32>
    %75 = arith.mulf %59, %67 : vector<8x128xf32>
    %76 = arith.addf %74, %75 : vector<8x128xf32>
    %77 = math.tanh %76 : vector<8x128xf32>
    %78 = arith.mulf %73, %77 : vector<8x128xf32>
    %79 = arith.index_cast %c1_i32 : i32 to index
    %c0_26 = arith.constant 0 : index
    %c0_27 = arith.constant 0 : index
    %80 = vector.load %arg9[%79, %c0_26, %c0_27] : memref<8x8x128xf32, #tpu.memory_space<vmem>>, vector<1x8x128xf32>
    %81 = vector.shape_cast %80 : vector<1x8x128xf32> to vector<8x128xf32>
    %82 = vector.shape_cast %78 : vector<8x128xf32> to vector<1x8x128xf32>
    tpu.vector_store %arg9[%79, %c0_26, %c0_27], %82 {strides = array<i32>} : memref<8x8x128xf32, #tpu.memory_space<vmem>>, vector<1x8x128xf32>,
    %c2_i32 = arith.constant 2 : i32
    %c8_i32_28 = arith.constant 8 : i32
    %83 = arith.muli %c2_i32, %c8_i32_28 : i32
    %84 = tpu.assume_multiple %83, 8 : i32
    %85 = arith.index_cast %84 : i32 to index
    %c0_29 = arith.constant 0 : index
    %86 = vector.load %arg8[%85, %c0_29] : memref<64x512xf32, #tpu.memory_space<vmem>>, vector<8x512xf32>
    %87 = arith.truncf %78 : vector<8x128xf32> to vector<8x128xbf16>
    %c0_30 = arith.constant 0 : index
    %c0_31 = arith.constant 0 : index
    %88 = vector.load %arg3[%c0_30, %c0_31] : memref<128x512xbf16, #tpu.memory_space<vmem>>, vector<128x512xbf16>
    %cst_32 = arith.constant dense<0.000000e+00> : vector<8x512xf32>
    %89 = tpu.matmul %87, %88, %cst_32 {dimension_numbers = #tpu.dot_dimension_numbers<[1], [0], [0], [1], [0, 0, 1, 1], [], []>} : vector<8x128xbf16>, vector<128x512xbf16>, vector<8x512xf32> -> vector<8x512xf32>
    %90 = arith.addf %86, %89 : vector<8x512xf32>
    %91 = vector.extract_strided_slice %90 {offsets = [0, 0], sizes = [8, 128], strides = [1, 1]} : vector<8x512xf32> to vector<8x128xf32>
    %92 = arith.negf %91 : vector<8x128xf32>
    %93 = math.exp %92 : vector<8x128xf32>
    %cst_33 = arith.constant 1.000000e+00 : f32
    %94 = vector.broadcast %cst_33 : f32 to vector<8x128xf32>
    %95 = arith.addf %94, %93 : vector<8x128xf32>
    %96 = arith.divf %94, %95 : vector<8x128xf32>
    %97 = vector.extract_strided_slice %90 {offsets = [0, 128], sizes = [8, 128], strides = [1, 1]} : vector<8x512xf32> to vector<8x128xf32>
    %98 = arith.negf %97 : vector<8x128xf32>
    %99 = math.exp %98 : vector<8x128xf32>
    %cst_34 = arith.constant 1.000000e+00 : f32
    %100 = vector.broadcast %cst_34 : f32 to vector<8x128xf32>
    %101 = arith.addf %100, %99 : vector<8x128xf32>
    %102 = arith.divf %100, %101 : vector<8x128xf32>
    %103 = vector.extract_strided_slice %90 {offsets = [0, 256], sizes = [8, 128], strides = [1, 1]} : vector<8x512xf32> to vector<8x128xf32>
    %104 = math.tanh %103 : vector<8x128xf32>
    %105 = vector.extract_strided_slice %90 {offsets = [0, 384], sizes = [8, 128], strides = [1, 1]} : vector<8x512xf32> to vector<8x128xf32>
    %106 = arith.negf %105 : vector<8x128xf32>
    %107 = math.exp %106 : vector<8x128xf32>
    %cst_35 = arith.constant 1.000000e+00 : f32
    %108 = vector.broadcast %cst_35 : f32 to vector<8x128xf32>
    %109 = arith.addf %108, %107 : vector<8x128xf32>
    %110 = arith.divf %108, %109 : vector<8x128xf32>
    %111 = arith.mulf %102, %76 : vector<8x128xf32>
    %112 = arith.mulf %96, %104 : vector<8x128xf32>
    %113 = arith.addf %111, %112 : vector<8x128xf32>
    %114 = math.tanh %113 : vector<8x128xf32>
    %115 = arith.mulf %110, %114 : vector<8x128xf32>
    %116 = arith.index_cast %c2_i32 : i32 to index
    %c0_36 = arith.constant 0 : index
    %c0_37 = arith.constant 0 : index
    %117 = vector.load %arg9[%116, %c0_36, %c0_37] : memref<8x8x128xf32, #tpu.memory_space<vmem>>, vector<1x8x128xf32>
    %118 = vector.shape_cast %117 : vector<1x8x128xf32> to vector<8x128xf32>
    %119 = vector.shape_cast %115 : vector<8x128xf32> to vector<1x8x128xf32>
    tpu.vector_store %arg9[%116, %c0_36, %c0_37], %119 {strides = array<i32>} : memref<8x8x128xf32, #tpu.memory_space<vmem>>, vector<1x8x128xf32>,
    %c3_i32 = arith.constant 3 : i32
    %c8_i32_38 = arith.constant 8 : i32
    %120 = arith.muli %c3_i32, %c8_i32_38 : i32
    %121 = tpu.assume_multiple %120, 8 : i32
    %122 = arith.index_cast %121 : i32 to index
    %c0_39 = arith.constant 0 : index
    %123 = vector.load %arg8[%122, %c0_39] : memref<64x512xf32, #tpu.memory_space<vmem>>, vector<8x512xf32>
    %124 = arith.truncf %115 : vector<8x128xf32> to vector<8x128xbf16>
    %c0_40 = arith.constant 0 : index
    %c0_41 = arith.constant 0 : index
    %125 = vector.load %arg3[%c0_40, %c0_41] : memref<128x512xbf16, #tpu.memory_space<vmem>>, vector<128x512xbf16>
    %cst_42 = arith.constant dense<0.000000e+00> : vector<8x512xf32>
    %126 = tpu.matmul %124, %125, %cst_42 {dimension_numbers = #tpu.dot_dimension_numbers<[1], [0], [0], [1], [0, 0, 1, 1], [], []>} : vector<8x128xbf16>, vector<128x512xbf16>, vector<8x512xf32> -> vector<8x512xf32>
    %127 = arith.addf %123, %126 : vector<8x512xf32>
    %128 = vector.extract_strided_slice %127 {offsets = [0, 0], sizes = [8, 128], strides = [1, 1]} : vector<8x512xf32> to vector<8x128xf32>
    %129 = arith.negf %128 : vector<8x128xf32>
    %130 = math.exp %129 : vector<8x128xf32>
    %cst_43 = arith.constant 1.000000e+00 : f32
    %131 = vector.broadcast %cst_43 : f32 to vector<8x128xf32>
    %132 = arith.addf %131, %130 : vector<8x128xf32>
    %133 = arith.divf %131, %132 : vector<8x128xf32>
    %134 = vector.extract_strided_slice %127 {offsets = [0, 128], sizes = [8, 128], strides = [1, 1]} : vector<8x512xf32> to vector<8x128xf32>
    %135 = arith.negf %134 : vector<8x128xf32>
    %136 = math.exp %135 : vector<8x128xf32>
    %cst_44 = arith.constant 1.000000e+00 : f32
    %137 = vector.broadcast %cst_44 : f32 to vector<8x128xf32>
    %138 = arith.addf %137, %136 : vector<8x128xf32>
    %139 = arith.divf %137, %138 : vector<8x128xf32>
    %140 = vector.extract_strided_slice %127 {offsets = [0, 256], sizes = [8, 128], strides = [1, 1]} : vector<8x512xf32> to vector<8x128xf32>
    %141 = math.tanh %140 : vector<8x128xf32>
    %142 = vector.extract_strided_slice %127 {offsets = [0, 384], sizes = [8, 128], strides = [1, 1]} : vector<8x512xf32> to vector<8x128xf32>
    %143 = arith.negf %142 : vector<8x128xf32>
    %144 = math.exp %143 : vector<8x128xf32>
    %cst_45 = arith.constant 1.000000e+00 : f32
    %145 = vector.broadcast %cst_45 : f32 to vector<8x128xf32>
    %146 = arith.addf %145, %144 : vector<8x128xf32>
    %147 = arith.divf %145, %146 : vector<8x128xf32>
    %148 = arith.mulf %139, %113 : vector<8x128xf32>
    %149 = arith.mulf %133, %141 : vector<8x128xf32>
    %150 = arith.addf %148, %149 : vector<8x128xf32>
    %151 = math.tanh %150 : vector<8x128xf32>
    %152 = arith.mulf %147, %151 : vector<8x128xf32>
    %153 = arith.index_cast %c3_i32 : i32 to index
    %c0_46 = arith.constant 0 : index
    %c0_47 = arith.constant 0 : index
    %154 = vector.load %arg9[%153, %c0_46, %c0_47] : memref<8x8x128xf32, #tpu.memory_space<vmem>>, vector<1x8x128xf32>
    %155 = vector.shape_cast %154 : vector<1x8x128xf32> to vector<8x128xf32>
    %156 = vector.shape_cast %152 : vector<8x128xf32> to vector<1x8x128xf32>
    tpu.vector_store %arg9[%153, %c0_46, %c0_47], %156 {strides = array<i32>} : memref<8x8x128xf32, #tpu.memory_space<vmem>>, vector<1x8x128xf32>,
    %c4_i32 = arith.constant 4 : i32
    %c8_i32_48 = arith.constant 8 : i32
    %157 = arith.muli %c4_i32, %c8_i32_48 : i32
    %158 = tpu.assume_multiple %157, 8 : i32
    %159 = arith.index_cast %158 : i32 to index
    %c0_49 = arith.constant 0 : index
    %160 = vector.load %arg8[%159, %c0_49] : memref<64x512xf32, #tpu.memory_space<vmem>>, vector<8x512xf32>
    %161 = arith.truncf %152 : vector<8x128xf32> to vector<8x128xbf16>
    %c0_50 = arith.constant 0 : index
    %c0_51 = arith.constant 0 : index
    %162 = vector.load %arg3[%c0_50, %c0_51] : memref<128x512xbf16, #tpu.memory_space<vmem>>, vector<128x512xbf16>
    %cst_52 = arith.constant dense<0.000000e+00> : vector<8x512xf32>
    %163 = tpu.matmul %161, %162, %cst_52 {dimension_numbers = #tpu.dot_dimension_numbers<[1], [0], [0], [1], [0, 0, 1, 1], [], []>} : vector<8x128xbf16>, vector<128x512xbf16>, vector<8x512xf32> -> vector<8x512xf32>
    %164 = arith.addf %160, %163 : vector<8x512xf32>
    %165 = vector.extract_strided_slice %164 {offsets = [0, 0], sizes = [8, 128], strides = [1, 1]} : vector<8x512xf32> to vector<8x128xf32>
    %166 = arith.negf %165 : vector<8x128xf32>
    %167 = math.exp %166 : vector<8x128xf32>
    %cst_53 = arith.constant 1.000000e+00 : f32
    %168 = vector.broadcast %cst_53 : f32 to vector<8x128xf32>
    %169 = arith.addf %168, %167 : vector<8x128xf32>
    %170 = arith.divf %168, %169 : vector<8x128xf32>
    %171 = vector.extract_strided_slice %164 {offsets = [0, 128], sizes = [8, 128], strides = [1, 1]} : vector<8x512xf32> to vector<8x128xf32>
    %172 = arith.negf %171 : vector<8x128xf32>
    %173 = math.exp %172 : vector<8x128xf32>
    %cst_54 = arith.constant 1.000000e+00 : f32
    %174 = vector.broadcast %cst_54 : f32 to vector<8x128xf32>
    %175 = arith.addf %174, %173 : vector<8x128xf32>
    %176 = arith.divf %174, %175 : vector<8x128xf32>
    %177 = vector.extract_strided_slice %164 {offsets = [0, 256], sizes = [8, 128], strides = [1, 1]} : vector<8x512xf32> to vector<8x128xf32>
    %178 = math.tanh %177 : vector<8x128xf32>
    %179 = vector.extract_strided_slice %164 {offsets = [0, 384], sizes = [8, 128], strides = [1, 1]} : vector<8x512xf32> to vector<8x128xf32>
    %180 = arith.negf %179 : vector<8x128xf32>
    %181 = math.exp %180 : vector<8x128xf32>
    %cst_55 = arith.constant 1.000000e+00 : f32
    %182 = vector.broadcast %cst_55 : f32 to vector<8x128xf32>
    %183 = arith.addf %182, %181 : vector<8x128xf32>
    %184 = arith.divf %182, %183 : vector<8x128xf32>
    %185 = arith.mulf %176, %150 : vector<8x128xf32>
    %186 = arith.mulf %170, %178 : vector<8x128xf32>
    %187 = arith.addf %185, %186 : vector<8x128xf32>
    %188 = math.tanh %187 : vector<8x128xf32>
    %189 = arith.mulf %184, %188 : vector<8x128xf32>
    %190 = arith.index_cast %c4_i32 : i32 to index
    %c0_56 = arith.constant 0 : index
    %c0_57 = arith.constant 0 : index
    %191 = vector.load %arg9[%190, %c0_56, %c0_57] : memref<8x8x128xf32, #tpu.memory_space<vmem>>, vector<1x8x128xf32>
    %192 = vector.shape_cast %191 : vector<1x8x128xf32> to vector<8x128xf32>
    %193 = vector.shape_cast %189 : vector<8x128xf32> to vector<1x8x128xf32>
    tpu.vector_store %arg9[%190, %c0_56, %c0_57], %193 {strides = array<i32>} : memref<8x8x128xf32, #tpu.memory_space<vmem>>, vector<1x8x128xf32>,
    %c5_i32 = arith.constant 5 : i32
    %c8_i32_58 = arith.constant 8 : i32
    %194 = arith.muli %c5_i32, %c8_i32_58 : i32
    %195 = tpu.assume_multiple %194, 8 : i32
    %196 = arith.index_cast %195 : i32 to index
    %c0_59 = arith.constant 0 : index
    %197 = vector.load %arg8[%196, %c0_59] : memref<64x512xf32, #tpu.memory_space<vmem>>, vector<8x512xf32>
    %198 = arith.truncf %189 : vector<8x128xf32> to vector<8x128xbf16>
    %c0_60 = arith.constant 0 : index
    %c0_61 = arith.constant 0 : index
    %199 = vector.load %arg3[%c0_60, %c0_61] : memref<128x512xbf16, #tpu.memory_space<vmem>>, vector<128x512xbf16>
    %cst_62 = arith.constant dense<0.000000e+00> : vector<8x512xf32>
    %200 = tpu.matmul %198, %199, %cst_62 {dimension_numbers = #tpu.dot_dimension_numbers<[1], [0], [0], [1], [0, 0, 1, 1], [], []>} : vector<8x128xbf16>, vector<128x512xbf16>, vector<8x512xf32> -> vector<8x512xf32>
    %201 = arith.addf %197, %200 : vector<8x512xf32>
    %202 = vector.extract_strided_slice %201 {offsets = [0, 0], sizes = [8, 128], strides = [1, 1]} : vector<8x512xf32> to vector<8x128xf32>
    %203 = arith.negf %202 : vector<8x128xf32>
    %204 = math.exp %203 : vector<8x128xf32>
    %cst_63 = arith.constant 1.000000e+00 : f32
    %205 = vector.broadcast %cst_63 : f32 to vector<8x128xf32>
    %206 = arith.addf %205, %204 : vector<8x128xf32>
    %207 = arith.divf %205, %206 : vector<8x128xf32>
    %208 = vector.extract_strided_slice %201 {offsets = [0, 128], sizes = [8, 128], strides = [1, 1]} : vector<8x512xf32> to vector<8x128xf32>
    %209 = arith.negf %208 : vector<8x128xf32>
    %210 = math.exp %209 : vector<8x128xf32>
    %cst_64 = arith.constant 1.000000e+00 : f32
    %211 = vector.broadcast %cst_64 : f32 to vector<8x128xf32>
    %212 = arith.addf %211, %210 : vector<8x128xf32>
    %213 = arith.divf %211, %212 : vector<8x128xf32>
    %214 = vector.extract_strided_slice %201 {offsets = [0, 256], sizes = [8, 128], strides = [1, 1]} : vector<8x512xf32> to vector<8x128xf32>
    %215 = math.tanh %214 : vector<8x128xf32>
    %216 = vector.extract_strided_slice %201 {offsets = [0, 384], sizes = [8, 128], strides = [1, 1]} : vector<8x512xf32> to vector<8x128xf32>
    %217 = arith.negf %216 : vector<8x128xf32>
    %218 = math.exp %217 : vector<8x128xf32>
    %cst_65 = arith.constant 1.000000e+00 : f32
    %219 = vector.broadcast %cst_65 : f32 to vector<8x128xf32>
    %220 = arith.addf %219, %218 : vector<8x128xf32>
    %221 = arith.divf %219, %220 : vector<8x128xf32>
    %222 = arith.mulf %213, %187 : vector<8x128xf32>
    %223 = arith.mulf %207, %215 : vector<8x128xf32>
    %224 = arith.addf %222, %223 : vector<8x128xf32>
    %225 = math.tanh %224 : vector<8x128xf32>
    %226 = arith.mulf %221, %225 : vector<8x128xf32>
    %227 = arith.index_cast %c5_i32 : i32 to index
    %c0_66 = arith.constant 0 : index
    %c0_67 = arith.constant 0 : index
    %228 = vector.load %arg9[%227, %c0_66, %c0_67] : memref<8x8x128xf32, #tpu.memory_space<vmem>>, vector<1x8x128xf32>
    %229 = vector.shape_cast %228 : vector<1x8x128xf32> to vector<8x128xf32>
    %230 = vector.shape_cast %226 : vector<8x128xf32> to vector<1x8x128xf32>
    tpu.vector_store %arg9[%227, %c0_66, %c0_67], %230 {strides = array<i32>} : memref<8x8x128xf32, #tpu.memory_space<vmem>>, vector<1x8x128xf32>,
    %c6_i32 = arith.constant 6 : i32
    %c8_i32_68 = arith.constant 8 : i32
    %231 = arith.muli %c6_i32, %c8_i32_68 : i32
    %232 = tpu.assume_multiple %231, 8 : i32
    %233 = arith.index_cast %232 : i32 to index
    %c0_69 = arith.constant 0 : index
    %234 = vector.load %arg8[%233, %c0_69] : memref<64x512xf32, #tpu.memory_space<vmem>>, vector<8x512xf32>
    %235 = arith.truncf %226 : vector<8x128xf32> to vector<8x128xbf16>
    %c0_70 = arith.constant 0 : index
    %c0_71 = arith.constant 0 : index
    %236 = vector.load %arg3[%c0_70, %c0_71] : memref<128x512xbf16, #tpu.memory_space<vmem>>, vector<128x512xbf16>
    %cst_72 = arith.constant dense<0.000000e+00> : vector<8x512xf32>
    %237 = tpu.matmul %235, %236, %cst_72 {dimension_numbers = #tpu.dot_dimension_numbers<[1], [0], [0], [1], [0, 0, 1, 1], [], []>} : vector<8x128xbf16>, vector<128x512xbf16>, vector<8x512xf32> -> vector<8x512xf32>
    %238 = arith.addf %234, %237 : vector<8x512xf32>
    %239 = vector.extract_strided_slice %238 {offsets = [0, 0], sizes = [8, 128], strides = [1, 1]} : vector<8x512xf32> to vector<8x128xf32>
    %240 = arith.negf %239 : vector<8x128xf32>
    %241 = math.exp %240 : vector<8x128xf32>
    %cst_73 = arith.constant 1.000000e+00 : f32
    %242 = vector.broadcast %cst_73 : f32 to vector<8x128xf32>
    %243 = arith.addf %242, %241 : vector<8x128xf32>
    %244 = arith.divf %242, %243 : vector<8x128xf32>
    %245 = vector.extract_strided_slice %238 {offsets = [0, 128], sizes = [8, 128], strides = [1, 1]} : vector<8x512xf32> to vector<8x128xf32>
    %246 = arith.negf %245 : vector<8x128xf32>
    %247 = math.exp %246 : vector<8x128xf32>
    %cst_74 = arith.constant 1.000000e+00 : f32
    %248 = vector.broadcast %cst_74 : f32 to vector<8x128xf32>
    %249 = arith.addf %248, %247 : vector<8x128xf32>
    %250 = arith.divf %248, %249 : vector<8x128xf32>
    %251 = vector.extract_strided_slice %238 {offsets = [0, 256], sizes = [8, 128], strides = [1, 1]} : vector<8x512xf32> to vector<8x128xf32>
    %252 = math.tanh %251 : vector<8x128xf32>
    %253 = vector.extract_strided_slice %238 {offsets = [0, 384], sizes = [8, 128], strides = [1, 1]} : vector<8x512xf32> to vector<8x128xf32>
    %254 = arith.negf %253 : vector<8x128xf32>
    %255 = math.exp %254 : vector<8x128xf32>
    %cst_75 = arith.constant 1.000000e+00 : f32
    %256 = vector.broadcast %cst_75 : f32 to vector<8x128xf32>
    %257 = arith.addf %256, %255 : vector<8x128xf32>
    %258 = arith.divf %256, %257 : vector<8x128xf32>
    %259 = arith.mulf %250, %224 : vector<8x128xf32>
    %260 = arith.mulf %244, %252 : vector<8x128xf32>
    %261 = arith.addf %259, %260 : vector<8x128xf32>
    %262 = math.tanh %261 : vector<8x128xf32>
    %263 = arith.mulf %258, %262 : vector<8x128xf32>
    %264 = arith.index_cast %c6_i32 : i32 to index
    %c0_76 = arith.constant 0 : index
    %c0_77 = arith.constant 0 : index
    %265 = vector.load %arg9[%264, %c0_76, %c0_77] : memref<8x8x128xf32, #tpu.memory_space<vmem>>, vector<1x8x128xf32>
    %266 = vector.shape_cast %265 : vector<1x8x128xf32> to vector<8x128xf32>
    %267 = vector.shape_cast %263 : vector<8x128xf32> to vector<1x8x128xf32>
    tpu.vector_store %arg9[%264, %c0_76, %c0_77], %267 {strides = array<i32>} : memref<8x8x128xf32, #tpu.memory_space<vmem>>, vector<1x8x128xf32>,
    %c7_i32 = arith.constant 7 : i32
    %c8_i32_78 = arith.constant 8 : i32
    %268 = arith.muli %c7_i32, %c8_i32_78 : i32
    %269 = tpu.assume_multiple %268, 8 : i32
    %270 = arith.index_cast %269 : i32 to index
    %c0_79 = arith.constant 0 : index
    %271 = vector.load %arg8[%270, %c0_79] : memref<64x512xf32, #tpu.memory_space<vmem>>, vector<8x512xf32>
    %272 = arith.truncf %263 : vector<8x128xf32> to vector<8x128xbf16>
    %c0_80 = arith.constant 0 : index
    %c0_81 = arith.constant 0 : index
    %273 = vector.load %arg3[%c0_80, %c0_81] : memref<128x512xbf16, #tpu.memory_space<vmem>>, vector<128x512xbf16>
    %cst_82 = arith.constant dense<0.000000e+00> : vector<8x512xf32>
    %274 = tpu.matmul %272, %273, %cst_82 {dimension_numbers = #tpu.dot_dimension_numbers<[1], [0], [0], [1], [0, 0, 1, 1], [], []>} : vector<8x128xbf16>, vector<128x512xbf16>, vector<8x512xf32> -> vector<8x512xf32>
    %275 = arith.addf %271, %274 : vector<8x512xf32>
    %276 = vector.extract_strided_slice %275 {offsets = [0, 0], sizes = [8, 128], strides = [1, 1]} : vector<8x512xf32> to vector<8x128xf32>
    %277 = arith.negf %276 : vector<8x128xf32>
    %278 = math.exp %277 : vector<8x128xf32>
    %cst_83 = arith.constant 1.000000e+00 : f32
    %279 = vector.broadcast %cst_83 : f32 to vector<8x128xf32>
    %280 = arith.addf %279, %278 : vector<8x128xf32>
    %281 = arith.divf %279, %280 : vector<8x128xf32>
    %282 = vector.extract_strided_slice %275 {offsets = [0, 128], sizes = [8, 128], strides = [1, 1]} : vector<8x512xf32> to vector<8x128xf32>
    %283 = arith.negf %282 : vector<8x128xf32>
    %284 = math.exp %283 : vector<8x128xf32>
    %cst_84 = arith.constant 1.000000e+00 : f32
    %285 = vector.broadcast %cst_84 : f32 to vector<8x128xf32>
    %286 = arith.addf %285, %284 : vector<8x128xf32>
    %287 = arith.divf %285, %286 : vector<8x128xf32>
    %288 = vector.extract_strided_slice %275 {offsets = [0, 256], sizes = [8, 128], strides = [1, 1]} : vector<8x512xf32> to vector<8x128xf32>
    %289 = math.tanh %288 : vector<8x128xf32>
    %290 = vector.extract_strided_slice %275 {offsets = [0, 384], sizes = [8, 128], strides = [1, 1]} : vector<8x512xf32> to vector<8x128xf32>
    %291 = arith.negf %290 : vector<8x128xf32>
    %292 = math.exp %291 : vector<8x128xf32>
    %cst_85 = arith.constant 1.000000e+00 : f32
    %293 = vector.broadcast %cst_85 : f32 to vector<8x128xf32>
    %294 = arith.addf %293, %292 : vector<8x128xf32>
    %295 = arith.divf %293, %294 : vector<8x128xf32>
    %296 = arith.mulf %287, %261 : vector<8x128xf32>
    %297 = arith.mulf %281, %289 : vector<8x128xf32>
    %298 = arith.addf %296, %297 : vector<8x128xf32>
    %299 = math.tanh %298 : vector<8x128xf32>
    %300 = arith.mulf %295, %299 : vector<8x128xf32>
    %301 = arith.index_cast %c7_i32 : i32 to index
    %c0_86 = arith.constant 0 : index
    %c0_87 = arith.constant 0 : index
    %302 = vector.load %arg9[%301, %c0_86, %c0_87] : memref<8x8x128xf32, #tpu.memory_space<vmem>>, vector<1x8x128xf32>
    %303 = vector.shape_cast %302 : vector<1x8x128xf32> to vector<8x128xf32>
    %304 = vector.shape_cast %300 : vector<8x128xf32> to vector<1x8x128xf32>
    tpu.vector_store %arg9[%301, %c0_86, %c0_87], %304 {strides = array<i32>} : memref<8x8x128xf32, #tpu.memory_space<vmem>>, vector<1x8x128xf32>,
    %c8_i32_88 = arith.constant 8 : i32
    %c0_89 = arith.constant 0 : index
    %c0_90 = arith.constant 0 : index
    %c0_91 = arith.constant 0 : index
    %305 = vector.load %arg9[%c0_89, %c0_90, %c0_91] : memref<8x8x128xf32, #tpu.memory_space<vmem>>, vector<8x8x128xf32>
    %306 = vector.shape_cast %305 : vector<8x8x128xf32> to vector<64x128xf32>
    %307 = arith.truncf %306 : vector<64x128xf32> to vector<64x128xbf16>
    %c0_92 = arith.constant 0 : index
    %c0_93 = arith.constant 0 : index
    %308 = vector.load %arg5[%c0_92, %c0_93] : memref<128x128xbf16, #tpu.memory_space<vmem>>, vector<128x128xbf16>
    %cst_94 = arith.constant dense<0.000000e+00> : vector<64x128xf32>
    %309 = tpu.matmul %307, %308, %cst_94 {dimension_numbers = #tpu.dot_dimension_numbers<[1], [0], [0], [1], [0, 0, 1, 1], [], []>} : vector<64x128xbf16>, vector<128x128xbf16>, vector<64x128xf32> -> vector<64x128xf32>
    %c0_95 = arith.constant 0 : index
    %c0_96 = arith.constant 0 : index
    %310 = vector.load %arg6[%c0_95, %c0_96] : memref<1x128xf32, #tpu.memory_space<vmem>>, vector<1x128xf32>
    %311 = vector.broadcast %310 : vector<1x128xf32> to vector<64x128xf32>
    %312 = arith.addf %309, %311 : vector<64x128xf32>
    %cst_97 = arith.constant 0.000000e+00 : f32
    %cst_98 = arith.constant 1.000000e+02 : f32
    %313 = vector.broadcast %cst_97 : f32 to vector<64x128xf32>
    %314 = arith.maximumf %313, %312 : vector<64x128xf32>
    %315 = vector.broadcast %cst_98 : f32 to vector<64x128xf32>
    %316 = arith.minimumf %315, %314 : vector<64x128xf32>
    %c0_99 = arith.constant 0 : index
    %c0_100 = arith.constant 0 : index
    %317 = vector.load %arg7[%c0_99, %c0_100] : memref<64x128xf32, #tpu.memory_space<vmem>>, vector<64x128xf32>
    tpu.vector_store %arg7[%c0_99, %c0_100], %316 {strides = array<i32>} : memref<64x128xf32, #tpu.memory_space<vmem>>, vector<64x128xf32>,
    return
  }
  func.func @transform_0(%arg0: i32) -> (i32, i32) {
    %c0_i32 = arith.constant 0 : i32
    %c0_i32_0 = arith.constant 0 : i32
    %c0_i32_1 = arith.constant 0 : i32
    return %c0_i32, %c0_i32_0 : i32, i32
  }
  func.func @transform_1(%arg0: i32) -> (i32, i32) {
    %c0_i32 = arith.constant 0 : i32
    %c0_i32_0 = arith.constant 0 : i32
    %c0_i32_1 = arith.constant 0 : i32
    return %c0_i32, %c0_i32_0 : i32, i32
  }
  func.func @transform_2(%arg0: i32) -> (i32, i32) {
    %c0_i32 = arith.constant 0 : i32
    %c0_i32_0 = arith.constant 0 : i32
    %c0_i32_1 = arith.constant 0 : i32
    return %c0_i32, %c0_i32_0 : i32, i32
  }
  func.func @transform_3(%arg0: i32) -> (i32, i32) {
    %c0_i32 = arith.constant 0 : i32
    %c0_i32_0 = arith.constant 0 : i32
    %c0_i32_1 = arith.constant 0 : i32
    return %c0_i32, %c0_i32_0 : i32, i32
  }
  func.func @transform_4(%arg0: i32) -> (i32, i32) {
    %c0_i32 = arith.constant 0 : i32
    %c0_i32_0 = arith.constant 0 : i32
    %c0_i32_1 = arith.constant 0 : i32
    return %c0_i32, %c0_i32_0 : i32, i32
  }
  func.func @transform_5(%arg0: i32) -> (i32, i32) {
    %c0_i32 = arith.constant 0 : i32
    %c0_i32_0 = arith.constant 0 : i32
    %c0_i32_1 = arith.constant 0 : i32
    return %c0_i32, %c0_i32_0 : i32, i32
  }
  func.func @transform_6(%arg0: i32) -> (i32, i32) {
    %c0_i32 = arith.constant 0 : i32
    %c0_i32_0 = arith.constant 0 : i32
    %c0_i32_1 = arith.constant 0 : i32
    return %c0_i32, %c0_i32_0 : i32, i32
  }
}

</mosaic_0001>

<bundles_post_ra>
// kernel: lstm_model_forward.1
= control target key start
LH: loop header
LB: loop body
LE: loop exit
PB: predicated region body
PF: predicated region fallthrough
CT: control target
= control target key end

     0   :  { %11 = vsyncpa [#allocation5], 0  ;;  %s4552_s0 = inlined_call_operand.vmem [shape: bf16[64,128], index: 0, kind: input, shape index: {}]   ;;  %s4553_s1 = inlined_call_operand.hbm [shape: bf16[128,512], index: 1, kind: input, shape index: {}]   ;;  %s4554_s2 = inlined_call_operand.hbm [shape: bf16[128,512], index: 2, kind: input, shape index: {}]   ;;  %s4555_s3 = inlined_call_operand.vmem [shape: f32[1,512], index: 3, kind: input, shape index: {}]   ;;  %s4556_s4 = inlined_call_operand.vmem [shape: bf16[128,128], index: 4, kind: input, shape index: {}]   ;;  %s4557_s5 = inlined_call_operand.vmem [shape: f32[1,128], index: 5, kind: input, shape index: {}]   ;;  %s4558_s6 = inlined_call_operand.vmem [shape: f32[64,128], index: 6, kind: output, shape index: {}]  }
   0x1   :  { %12 = vsyncpa [#allocation7], 0  ;;  %s3877_s21 = smov [#allocation4]   ;;  %s3829_s25 = scalar_lea.hbm %s4553_s1, 4096 }
   0x2   :  { %s20_s22 = sshll.u32 %s3877_s21, 4  ;;  %p3830_p0 = scmp.ne.s32.totalorder %s4553_s1, %s3829_s25  ;;  %s21_s22 = int_to_ptr.vmem [resolvable:$true] %s20_s22 }
   0x3   :  { %p3833_p1 = scmp.lt.u32.totalorder %s3829_s25, %s4553_s1 }
   0x5   :  { %p3835_p2 = pnand %p3833_p1, %p3830_p0 }
   0x7   :  { %3838 = shalt.err (!%p3835_p2)
}
   0x8   :  { %s3839_s30 = scalar_lea.vmem %s21_s22, 4096  ;;  %p3844_p4 = scmp.lt.s32.totalorder %s21_s22, %s21_s22 }
   0x9   :  { %p3840_p3 = scmp.ne.s32.totalorder %s21_s22, %s3839_s30  ;;  %p3845_p5 = scmp.lt.s32.totalorder %s3839_s30, %s3839_s30 }
   0xb   :  { %p3846_p6 = por %p3845_p5, %p3844_p4 }
   0xd   :  { %p3847_p7 = pnand %p3846_p6, %p3840_p3 }
   0xf   :  { %3850 = shalt.err (!%p3847_p7)
}
  0x10   :  { %s3878_s7 = smov 256   ;;  %s3879_s8 = smov 16  }
  0x11   :  { %26 = dma.hbm_to_vmem [thread:$0]  %s4553_s1, 4096, %s21_s22, [#allocation5], %s3878_s7, %s3878_s7, %s3879_s8  }
  0x12   :  { %s3880_s11 = smov [#allocation6]   ;;  %s3851_s15 = scalar_lea.hbm %s4554_s2, 4096 }
  0x13   :  { %s32_s12 = sshll.u32 %s3880_s11, 4  ;;  %p3852_p8 = scmp.ne.s32.totalorder %s4554_s2, %s3851_s15  ;;  %s33_s12 = int_to_ptr.vmem [resolvable:$true] %s32_s12 }
  0x14   :  { %p3855_p9 = scmp.lt.u32.totalorder %s3851_s15, %s4554_s2 }
  0x16   :  { %p3857_p10 = pnand %p3855_p9, %p3852_p8 }
  0x18   :  { %3860 = shalt.err (!%p3857_p10)
}
  0x19   :  { %s3861_s20 = scalar_lea.vmem %s33_s12, 4096  ;;  %p3866_p12 = scmp.lt.s32.totalorder %s33_s12, %s33_s12 }
  0x1a   :  { %p3862_p11 = scmp.ne.s32.totalorder %s33_s12, %s3861_s20  ;;  %p3867_p13 = scmp.lt.s32.totalorder %s3861_s20, %s3861_s20 }
  0x1c   :  { %p3868_p0 = por %p3867_p13, %p3866_p12 }
  0x1e   :  { %p3869_p1 = pnand %p3868_p0, %p3862_p11 }
  0x20   :  { %3872 = shalt.err (!%p3869_p1)
}
  0x21   :  { %38 = dma.hbm_to_vmem [thread:$0]  %s4554_s2, 4096, %s33_s12, [#allocation7], %s3878_s7, %s3878_s7, %s3879_s8  }
  0x22   :  { %3873 = dma.done.wait [#allocation5], 4096  }
  0x23   :  { %3874 = vsyncadd [#allocation5], 4294963200 }
  0x24   :  { %3875 = dma.done.wait [#allocation7], 4096  }
  0x25   :  { %3876 = vsyncadd [#allocation7], 4294963200  ;;  %v4559_v0 = vmov 0   ;;  %v3521_v1 = vld [vmem:[#allocation4 + $0x4] ss:$16 sps:$4 sm:$0xff]   ;;  %v3576_v39 = vld [vmem:[%s4552_s0 + $0x8] sm:$0xff]  }
  0x26   :  { %330 = vmatprep.mubr.bf16.mxu1 %v4559_v0  ;;  %707 = vmatprep.mubr.bf16.mxu0 %v4559_v0  ;;  %v3523_v2 = vld [vmem:[#allocation4] ss:$16 sps:$4 sm:$0xff]   ;;  %v3943_v3 = vld [vmem:[#allocation6 + $0x4] ss:$16 sps:$4 sm:$0xff]   ;;  %v3572_v32 = vld [vmem:[#allocation4 + $0xc] ss:$16 sps:$4 sm:$0xff]  }
  0x27   :  { %298 = vmatprep.subr.bf16.mxu1 %v3521_v1  ;;  %v3945_v4 = vld [vmem:[#allocation6] ss:$16 sps:$4 sm:$0xff]   ;;  %v3527_v5 = vld [vmem:[#allocation4 + $0x24] ss:$16 sps:$4 sm:$0xff]   ;;  %675 = vmatprep.subr.bf16.mxu0 %v3943_v3  ;;  %v3570_v35 = vld [vmem:[#allocation4 + $0x8] ss:$16 sps:$4 sm:$0xff]  }
  0x28   :  { %299 = vmatpush1.bf16.msra.mxu1 %v3523_v2  ;;  %v3529_v6 = vld [vmem:[#allocation4 + $0x20] ss:$16 sps:$4 sm:$0xff]   ;;  %v3948_v7 = vld [vmem:[#allocation6 + $0x24] ss:$16 sps:$4 sm:$0xff]   ;;  %676 = vmatpush1.bf16.msra.mxu0 %v3945_v4  ;;  %v3575_v36 = vld [vmem:[#allocation4 + $0x2c] ss:$16 sps:$4 sm:$0xff]  }
  0x29   :  { %300 = vmatprep.subr.bf16.mxu1 %v3527_v5  ;;  %v3951_v8 = vld [vmem:[#allocation6 + $0x20] ss:$16 sps:$4 sm:$0xff]   ;;  %677 = vmatprep.subr.bf16.mxu0 %v3948_v7  ;;  %v3533_v9 = vld [vmem:[#allocation4 + $0x44] ss:$16 sps:$4 sm:$0xff]   ;;  %v3573_v37 = vld [vmem:[#allocation4 + $0x28] ss:$16 sps:$4 sm:$0xff]  }
  0x2a   :  { %v3535_v10 = vld [vmem:[#allocation4 + $0x40] ss:$16 sps:$4 sm:$0xff]   ;;  %v3954_v11 = vld [vmem:[#allocation6 + $0x44] ss:$16 sps:$4 sm:$0xff]   ;;  %v3579_v38 = vld [vmem:[#allocation4 + $0x4c] ss:$16 sps:$4 sm:$0xff]  }
  0x2b   :  { %v3539_v12 = vld [vmem:[#allocation4 + $0x64] ss:$16 sps:$4 sm:$0xff]   ;;  %v3957_v13 = vld [vmem:[#allocation6 + $0x40] ss:$16 sps:$4 sm:$0xff]   ;;  %v3577_v40 = vld [vmem:[#allocation4 + $0x48] ss:$16 sps:$4 sm:$0xff]  }
  0x2c   :  { %301 = vmatpush1.bf16.msra.mxu1 %v3529_v6  ;;  %678 = vmatpush1.bf16.msra.mxu0 %v3951_v8  ;;  %v3960_v14 = vld [vmem:[#allocation6 + $0x64] ss:$16 sps:$4 sm:$0xff]   ;;  %v3541_v15 = vld [vmem:[#allocation4 + $0x60] ss:$16 sps:$4 sm:$0xff]   ;;  %v3582_v41 = vld [vmem:[#allocation4 + $0x6c] ss:$16 sps:$4 sm:$0xff]  }
  0x2d   :  { %302 = vmatprep.subr.bf16.mxu1 %v3533_v9  ;;  %679 = vmatprep.subr.bf16.mxu0 %v3954_v11  ;;  %v3545_v16 = vld [vmem:[#allocation4 + $0x84] ss:$16 sps:$4 sm:$0xff]   ;;  %v3963_v17 = vld [vmem:[#allocation6 + $0x60] ss:$16 sps:$4 sm:$0xff]   ;;  %v3580_v42 = vld [vmem:[#allocation4 + $0x68] ss:$16 sps:$4 sm:$0xff]   ;;  %v94_v9 = vlaneseq }
  0x2e   :  { %v3966_v18 = vld [vmem:[#allocation6 + $0x84] ss:$16 sps:$4 sm:$0xff]   ;;  %v3547_v19 = vld [vmem:[#allocation4 + $0x80] ss:$16 sps:$4 sm:$0xff]   ;;  %v3586_v43 = vld [vmem:[#allocation4 + $0x8c] ss:$16 sps:$4 sm:$0xff]  }
  0x2f   :  { %v3551_v20 = vld [vmem:[#allocation4 + $0xa4] ss:$16 sps:$4 sm:$0xff]   ;;  %v3969_v21 = vld [vmem:[#allocation6 + $0x80] ss:$16 sps:$4 sm:$0xff]   ;;  %v3584_v45 = vld [vmem:[#allocation4 + $0x88] ss:$16 sps:$4 sm:$0xff]  }
  0x30   :  { %303 = vmatpush1.bf16.msra.mxu1 %v3535_v10  ;;  %680 = vmatpush1.bf16.msra.mxu0 %v3957_v13  ;;  %v3972_v22 = vld [vmem:[#allocation6 + $0xa4] ss:$16 sps:$4 sm:$0xff]   ;;  %v3553_v23 = vld [vmem:[#allocation4 + $0xa0] ss:$16 sps:$4 sm:$0xff]   ;;  %v3589_v46 = vld [vmem:[#allocation4 + $0xac] ss:$16 sps:$4 sm:$0xff]  }
  0x31   :  { %304 = vmatprep.subr.bf16.mxu1 %v3539_v12  ;;  %681 = vmatprep.subr.bf16.mxu0 %v3960_v14  ;;  %v3557_v24 = vld [vmem:[#allocation4 + $0xc4] ss:$16 sps:$4 sm:$0xff]   ;;  %v3975_v25 = vld [vmem:[#allocation6 + $0xa0] ss:$16 sps:$4 sm:$0xff]   ;;  %v3587_v47 = vld [vmem:[#allocation4 + $0xa8] ss:$16 sps:$4 sm:$0xff]  }
  0x32   :  { %v3978_v26 = vld [vmem:[#allocation6 + $0xc4] ss:$16 sps:$4 sm:$0xff]   ;;  %v3559_v27 = vld [vmem:[#allocation4 + $0xc0] ss:$16 sps:$4 sm:$0xff]   ;;  %v3593_v48 = vld [vmem:[#allocation4 + $0xcc] ss:$16 sps:$4 sm:$0xff]  }
  0x33   :  { %v3563_v28 = vld [vmem:[#allocation4 + $0xe4] ss:$16 sps:$4 sm:$0xff]   ;;  %v3981_v29 = vld [vmem:[#allocation6 + $0xc0] ss:$16 sps:$4 sm:$0xff]   ;;  %v3590_v49 = vld [vmem:[%s4552_s0 + $0x18] sm:$0xff]   ;;  %v95_v10 = vshrl.u32 %v94_v9, 7 }
  0x34   :  { %305 = vmatpush1.bf16.msra.mxu1 %v3541_v15  ;;  %682 = vmatpush1.bf16.msra.mxu0 %v3963_v17  ;;  %v3984_v30 = vld [vmem:[#allocation6 + $0xe4] ss:$16 sps:$4 sm:$0xff]   ;;  %v3565_v31 = vld [vmem:[#allocation4 + $0xe0] ss:$16 sps:$4 sm:$0xff]   ;;  %v3591_v50 = vld [vmem:[#allocation4 + $0xc8] ss:$16 sps:$4 sm:$0xff]  }
  0x35   :  { %306 = vmatprep.subr.bf16.mxu1 %v3545_v16  ;;  %683 = vmatprep.subr.bf16.mxu0 %v3966_v18  ;;  %v3987_v33 = vld [vmem:[#allocation6 + $0xe0] ss:$16 sps:$4 sm:$0xff]   ;;  %v3596_v51 = vld [vmem:[#allocation4 + $0xec] ss:$16 sps:$4 sm:$0xff]   ;;  %v3594_v52 = vld [vmem:[#allocation4 + $0xe8] ss:$16 sps:$4 sm:$0xff]  }
  0x36   :  { %v3993_v34 = vld [vmem:[%s4552_s0] sm:$0xff]   ;;  %v3583_v44 = vld [vmem:[%s4552_s0 + $0x10] sm:$0xff]   ;;  %v4023_v53 = vld [vmem:[#allocation6 + $0xc] ss:$16 sps:$4 sm:$0xff]   ;;  %v96_v12 = vsub.s32 0, %v95_v10  ;;  %v100_v16 = vsub.s32 1, %v95_v10 }
  0x37   :  { %v4027_v54 = vld [vmem:[#allocation6 + $0x8] ss:$16 sps:$4 sm:$0xff]   ;;  %v4030_v55 = vld [vmem:[#allocation6 + $0x2c] ss:$16 sps:$4 sm:$0xff]   ;;  %v92_v15 = vld [vmem:[%s4555_s3] sm:$0xf] }
  0x38   :  { %307 = vmatpush1.bf16.msra.mxu1 %v3547_v19  ;;  %684 = vmatpush1.bf16.msra.mxu0 %v3969_v21  ;;  %v4034_v56 = vld [vmem:[#allocation6 + $0x28] ss:$16 sps:$4 sm:$0xff]   ;;  %v4042_v57 = vld [vmem:[#allocation6 + $0x4c] ss:$16 sps:$4 sm:$0xff]   ;;  %v97_v19 = vrot.slane %v92_v15, %v96_v12 }
  0x39   :  { %308 = vmatprep.subr.bf16.mxu1 %v3551_v20  ;;  %685 = vmatprep.subr.bf16.mxu0 %v3972_v22  ;;  %v4045_v58 = vld [vmem:[#allocation6 + $0x48] ss:$16 sps:$4 sm:$0xff]   ;;  %v4048_v59 = vld [vmem:[#allocation6 + $0x6c] ss:$16 sps:$4 sm:$0xff]   ;;  %v101_v20 = vrot.slane %v92_v15, %v100_v16 }
  0x3a   :  { %v4051_v60 = vld [vmem:[#allocation6 + $0x68] ss:$16 sps:$4 sm:$0xff]   ;;  %v4055_v61 = vld [vmem:[#allocation6 + $0x8c] ss:$16 sps:$4 sm:$0xff]  }
  0x3b   :  { %v4058_v62 = vld [vmem:[#allocation6 + $0x88] ss:$16 sps:$4 sm:$0xff]   ;;  %v4061_v63 = vld [vmem:[#allocation6 + $0xac] ss:$16 sps:$4 sm:$0xff]  }
  0x3c   :  { %309 = vmatpush1.bf16.msra.mxu1 %v3553_v23  ;;  %686 = vmatpush1.bf16.msra.mxu0 %v3975_v25  ;;  %v4064_v1 = vld [vmem:[#allocation6 + $0xa8] ss:$16 sps:$4 sm:$0xff]   ;;  %v4068_v2 = vld [vmem:[#allocation6 + $0xcc] ss:$16 sps:$4 sm:$0xff]  }
  0x3d   :  { %310 = vmatprep.subr.bf16.mxu1 %v3557_v24  ;;  %687 = vmatprep.subr.bf16.mxu0 %v3978_v26  ;;  %v4074_v5 = vld [vmem:[#allocation6 + $0xec] ss:$16 sps:$4 sm:$0xff]   ;;  %v4077_v6 = vld [vmem:[#allocation6 + $0xe8] ss:$16 sps:$4 sm:$0xff]  }
  0x40   :  { %311 = vmatpush1.bf16.msra.mxu1 %v3559_v27  ;;  %688 = vmatpush1.bf16.msra.mxu0 %v3981_v29 }
  0x41   :  { %312 = vmatprep.subr.bf16.mxu1 %v3563_v28  ;;  %689 = vmatprep.subr.bf16.mxu0 %v3984_v30 }
  0x44   :  { %313 = vmatpush1.bf16.msra.mxu1 %v3565_v31  ;;  %690 = vmatpush1.bf16.msra.mxu0 %v3987_v33 }
  0x45   :  { %371 = vmatprep.subr.bf16.mxu1 %v3572_v32  ;;  %986 = vmatprep.subr.bf16.mxu0 %v3943_v3 }
  0x47   :  { %331 = vmatmul.mubr.bf16.vlgmr.msra.gmra.mrb[0].mxu1 %v3993_v34  ;;  %708 = vmatmul.mubr.bf16.vlgmr.msra.gmra.mrb[0].mxu0 %v4559_v0 }
  0x48   :  { %372 = vmatpush1.bf16.msra.mxu1 %v3570_v35  ;;  %340 = vmatprep.mubr.bf16.mxu1 %v4559_v0 }
  0x49   :  { %373 = vmatprep.subr.bf16.mxu1 %v3575_v36  ;;  %987 = vmatpush1.bf16.msra.mxu0 %v3945_v4 }
  0x4a   :  { %1018 = vmatprep.mubr.bf16.mxu0 %v4559_v0  ;;  %988 = vmatprep.subr.bf16.mxu0 %v3948_v7 }
  0x4c   :  { %374 = vmatpush1.bf16.msra.mxu1 %v3573_v37 }
  0x4d   :  { %375 = vmatprep.subr.bf16.mxu1 %v3579_v38  ;;  %989 = vmatpush1.bf16.msra.mxu0 %v3951_v8 }
  0x4e   :  { %990 = vmatprep.subr.bf16.mxu0 %v3954_v11 }
  0x4f   :  { %341 = vmatmul.mubr.bf16.gmra.mrb[4].mxu1 %v3576_v39 }
  0x50   :  { %376 = vmatpush1.bf16.msra.mxu1 %v3577_v40  ;;  %350 = vmatprep.mubr.bf16.mxu1 %v4559_v0 }
  0x51   :  { %377 = vmatprep.subr.bf16.mxu1 %v3582_v41  ;;  %991 = vmatpush1.bf16.msra.mxu0 %v3957_v13 }
  0x52   :  { %992 = vmatprep.subr.bf16.mxu0 %v3960_v14 }
  0x54   :  { %378 = vmatpush1.bf16.msra.mxu1 %v3580_v42 }
  0x55   :  { %379 = vmatprep.subr.bf16.mxu1 %v3586_v43  ;;  %993 = vmatpush1.bf16.msra.mxu0 %v3963_v17 }
  0x56   :  { %994 = vmatprep.subr.bf16.mxu0 %v3966_v18 }
  0x57   :  { %351 = vmatmul.mubr.bf16.gmra.mrb[8].mxu1 %v3583_v44 }
  0x58   :  { %380 = vmatpush1.bf16.msra.mxu1 %v3584_v45  ;;  %360 = vmatprep.mubr.bf16.mxu1 %v4559_v0 }
  0x59   :  { %381 = vmatprep.subr.bf16.mxu1 %v3589_v46  ;;  %995 = vmatpush1.bf16.msra.mxu0 %v3969_v21 }
  0x5a   :  { %996 = vmatprep.subr.bf16.mxu0 %v3972_v22 }
  0x5c   :  { %382 = vmatpush1.bf16.msra.mxu1 %v3587_v47 }
  0x5d   :  { %383 = vmatprep.subr.bf16.mxu1 %v3593_v48  ;;  %997 = vmatpush1.bf16.msra.mxu0 %v3975_v25 }
  0x5e   :  { %998 = vmatprep.subr.bf16.mxu0 %v3978_v26 }
  0x5f   :  { %361 = vmatmul.mubr.bf16.gmra.mrb[12].mxu1 %v3590_v49 }
  0x60   :  { %384 = vmatpush1.bf16.msra.mxu1 %v3591_v50  ;;  %403 = vmatprep.mubr.bf16.mxu1 %v4559_v0 }
  0x61   :  { %385 = vmatprep.subr.bf16.mxu1 %v3596_v51  ;;  %999 = vmatpush1.bf16.msra.mxu0 %v3981_v29 }
  0x62   :  { %1000 = vmatprep.subr.bf16.mxu0 %v3984_v30 }
  0x64   :  { %386 = vmatpush1.bf16.msra.mxu1 %v3594_v52 }
  0x65   :  { %716 = vmatprep.subr.bf16.mxu1 %v4023_v53  ;;  %1001 = vmatpush1.bf16.msra.mxu0 %v3987_v33 }
  0x66   :  { %1298 = vmatprep.subr.bf16.mxu0 %v3943_v3  ;;  %v4071_v3 = vld [vmem:[#allocation6 + $0xc8] ss:$16 sps:$4 sm:$0xff]  }
  0x67   :  { %404 = vmatmul.mubr.bf16.vlgmr.msra.gmra.mrb[16].mxu1 %v3993_v34 }
  0x68   :  { %717 = vmatpush1.bf16.msra.mxu1 %v4027_v54  ;;  %413 = vmatprep.mubr.bf16.mxu1 %v4559_v0 }
  0x69   :  { %718 = vmatprep.subr.bf16.mxu1 %v4030_v55 }
  0x6c   :  { %719 = vmatpush1.bf16.msra.mxu1 %v4034_v56 }
  0x6d   :  { %720 = vmatprep.subr.bf16.mxu1 %v4042_v57 }
  0x6f   :  { %414 = vmatmul.mubr.bf16.gmra.mrb[20].mxu1 %v3576_v39 }
  0x70   :  { %721 = vmatpush1.bf16.msra.mxu1 %v4045_v58  ;;  %423 = vmatprep.mubr.bf16.mxu1 %v4559_v0 }
  0x71   :  { %722 = vmatprep.subr.bf16.mxu1 %v4048_v59 }
  0x74   :  { %723 = vmatpush1.bf16.msra.mxu1 %v4051_v60 }
  0x75   :  { %724 = vmatprep.subr.bf16.mxu1 %v4055_v61 }
  0x77   :  { %424 = vmatmul.mubr.bf16.gmra.mrb[24].mxu1 %v3583_v44 }
  0x78   :  { %725 = vmatpush1.bf16.msra.mxu1 %v4058_v62  ;;  %433 = vmatprep.mubr.bf16.mxu1 %v4559_v0 }
  0x79   :  { %726 = vmatprep.subr.bf16.mxu1 %v4061_v63 }
  0x7c   :  { %727 = vmatpush1.bf16.msra.mxu1 %v4064_v1 }
  0x7d   :  { %728 = vmatprep.subr.bf16.mxu1 %v4068_v2 }
  0x7f   :  { %434 = vmatmul.mubr.bf16.gmra.mrb[28].mxu1 %v3590_v49 }
  0x80   :  { %729 = vmatpush1.bf16.msra.mxu1 %v4071_v3  ;;  %748 = vmatprep.mubr.bf16.mxu1 %v4559_v0 }
  0x81   :  { %730 = vmatprep.subr.bf16.mxu1 %v4074_v5 }
  0x84   :  { %731 = vmatpush1.bf16.msra.mxu1 %v4077_v6 }
  0x85   :  { %1027 = vmatprep.subr.bf16.mxu1 %v4023_v53 }
  0x87   :  { %749 = vmatmul.mubr.bf16.vlgmr.msra.gmra.mrb[32].mxu1 %v4559_v0 }
  0x88   :  { %1028 = vmatpush1.bf16.msra.mxu1 %v4027_v54  ;;  %1059 = vmatprep.mubr.bf16.mxu1 %v4559_v0 }
  0x89   :  { %1029 = vmatprep.subr.bf16.mxu1 %v4030_v55 }
  0x8c   :  { %1030 = vmatpush1.bf16.msra.mxu1 %v4034_v56 }
  0x8d   :  { %1031 = vmatprep.subr.bf16.mxu1 %v4042_v57 }
  0x90   :  { %1032 = vmatpush1.bf16.msra.mxu1 %v4045_v58 }
  0x91   :  { %1033 = vmatprep.subr.bf16.mxu1 %v4048_v59 }
  0x94   :  { %1034 = vmatpush1.bf16.msra.mxu1 %v4051_v60 }
  0x95   :  { %1035 = vmatprep.subr.bf16.mxu1 %v4055_v61 }
  0x98   :  { %1036 = vmatpush1.bf16.msra.mxu1 %v4058_v62 }
  0x99   :  { %1037 = vmatprep.subr.bf16.mxu1 %v4061_v63 }
  0x9c   :  { %1038 = vmatpush1.bf16.msra.mxu1 %v4064_v1 }
  0x9d   :  { %1039 = vmatprep.subr.bf16.mxu1 %v4068_v2 }
  0xa0   :  { %1040 = vmatpush1.bf16.msra.mxu1 %v4071_v3 }
  0xa1   :  { %1041 = vmatprep.subr.bf16.mxu1 %v4074_v5 }
  0xa4   :  { %1042 = vmatpush1.bf16.msra.mxu1 %v4077_v6 }
  0xa5   :  { %1339 = vmatprep.subr.bf16.mxu1 %v4023_v53 }
 0x11a   :  { %v332_v23 = vpop.f32.mrb[0].mxu1  ;;  %v709_v32 = vpop.f32.mrb[0].mxu0 }
 0x11b   :  { %v333_v24 = vadd.f32 %v332_v23, %v97_v19  ;;  %v334_v27 = vpop.f32.mrb[1].mxu1  ;;  %v711_v37 = vpop.f32.mrb[1].mxu0 }
 0x11c   :  { %v335_v28 = vadd.f32 %v334_v27, %v101_v20  ;;  %v336_v31 = vpop.f32.mrb[2].mxu1  ;;  %v713_v40 = vpop.f32.mrb[2].mxu0 }
 0x11d   :  { %v4104_v34 = vadd.f32 %v336_v31, %v97_v19  ;;  %v757_v35 = vadd.f32 %v709_v32, %v333_v24  ;;  %v338_v36 = vpop.f32.mrb[3].mxu1  ;;  %v714_v41 = vpop.f32.mrb[3].mxu0 }
 0x11e   :  { %v4106_v38 = vadd.f32 %v338_v36, %v101_v20  ;;  %v758_v39 = vadd.f32 %v711_v37, %v335_v28 }
 0x122   :  { %v342_v42 = vpop.f32.mrb[4].mxu1 }
 0x123   :  { %v4108_v43 = vadd.f32 %v342_v42, %v97_v19  ;;  %v344_v44 = vpop.f32.mrb[5].mxu1  ;;  %v104_v42 = vsub.s32 2, %v95_v10 }
 0x124   :  { %v4110_v45 = vadd.f32 %v344_v44, %v101_v20  ;;  %v346_v46 = vpop.f32.mrb[6].mxu1  ;;  %v108_v44 = vsub.s32 3, %v95_v10 }
 0x125   :  { %v4112_v47 = vadd.f32 %v346_v46, %v97_v19  ;;  %v348_v48 = vpop.f32.mrb[7].mxu1 }
 0x126   :  { %v4114_v49 = vadd.f32 %v348_v48, %v101_v20  ;;  %v105_v48 = vrot.slane %v92_v15, %v104_v42 }
 0x12a   :  { %v352_v50 = vpop.f32.mrb[8].mxu1 }
 0x12b   :  { %v4116_v51 = vadd.f32 %v352_v50, %v97_v19  ;;  %v354_v52 = vpop.f32.mrb[9].mxu1 }
 0x12c   :  { %v4118_v9 = vadd.f32 %v354_v52, %v101_v20  ;;  %v356_v12 = vpop.f32.mrb[10].mxu1  ;;  %v109_v52 = vrot.slane %v92_v15, %v108_v44  ;;  %v3223_v15 = vmul.f32 -1.442695, %v757_v35 }
 0x12d   :  { %4561 = vst [vmem:[#allocation10_spill] sm:$0xff] %v4116_v51  ;;  %v4120_v16 = vadd.f32 %v356_v12, %v97_v19  ;;  %v358_v23 = vpop.f32.mrb[11].mxu1 }
 0x12e   :  { %4562 = vst [vmem:[#allocation11_spill] sm:$0xff] %v4118_v9  ;;  %v4122_v24 = vadd.f32 %v358_v23, %v101_v20 }
 0x12f   :  { %4563 = vst [vmem:[#allocation12_spill] sm:$0xff] %v4120_v16 }
 0x130   :  { %4564 = vst [vmem:[#allocation13_spill] sm:$0xff] %v4122_v24 }
 0x132   :  { %v362_v27 = vpop.f32.mrb[12].mxu1 }
 0x133   :  { %v4124_v28 = vadd.f32 %v362_v27, %v97_v19  ;;  %v364_v31 = vpop.f32.mrb[13].mxu1 }
 0x134   :  { %v4126_v32 = vadd.f32 %v364_v31, %v101_v20  ;;  %v366_v36 = vpop.f32.mrb[14].mxu1 }
 0x135   :  { %4565 = vst [vmem:[#allocation14_spill] sm:$0xff] %v4124_v28  ;;  %v4128_v37 = vadd.f32 %v366_v36, %v97_v19  ;;  %v368_v40 = vpop.f32.mrb[15].mxu1 }
 0x136   :  { %4566 = vst [vmem:[#allocation15_spill] sm:$0xff] %v4126_v32  ;;  %v4130_v41 = vadd.f32 %v368_v40, %v101_v20 }
 0x137   :  { %4567 = vst [vmem:[#allocation16_spill] sm:$0xff] %v4128_v37 }
 0x138   :  { %4568 = vst [vmem:[#allocation17_spill] sm:$0xff] %v4130_v41  ;;  %v3224_v41 = vmul.f32 -1.442695, %v758_v39 }
 0x13a   :  { %v405_v46 = vpop.f32.mrb[16].mxu1  ;;  %3701 = vpow2.f32 %v3224_v41 }
 0x13b   :  { %v407_v50 = vpop.f32.mrb[17].mxu1  ;;  %3703 = vpow2.f32 %v3223_v15 }
 0x13c   :  { %v409_v12 = vpop.f32.mrb[18].mxu1 }
 0x13d   :  { %v4132_v23 = vadd.f32 %v409_v12, %v105_v48  ;;  %v411_v27 = vpop.f32.mrb[19].mxu1 }
 0x13e   :  { %v4134_v0 = vadd.f32 %v411_v27, %v109_v52 }
 0x142   :  { %v415_v31 = vpop.f32.mrb[20].mxu1 }
 0x143   :  { %v4136_v32 = vadd.f32 %v415_v31, %v105_v48  ;;  %v417_v19 = vpop.f32.mrb[21].mxu1 }
 0x144   :  { %v4138_v36 = vadd.f32 %v417_v19, %v109_v52  ;;  %v419_v20 = vpop.f32.mrb[22].mxu1 }
 0x145   :  { %v4140_v40 = vadd.f32 %v419_v20, %v105_v48  ;;  %v421_v10 = vpop.f32.mrb[23].mxu1 }
 0x146   :  { %v4142_v42 = vadd.f32 %v421_v10, %v109_v52  ;;  %v3702_v10 = vpop.eup %3701 }
 0x147   :  { %v3704_v15 = vpop.eup %3703 }
 0x148   :  { %4569 = vst [vmem:[#allocation18_spill] sm:$0xff] %v4142_v42 }
 0x14a   :  { %v425_v44 = vpop.f32.mrb[24].mxu1 }
 0x14b   :  { %v4144_v12 = vadd.f32 %v425_v44, %v105_v48  ;;  %v427_v27 = vpop.f32.mrb[25].mxu1 }
 0x14c   :  { %v4146_v37 = vadd.f32 %v427_v27, %v109_v52  ;;  %v429_v31 = vpop.f32.mrb[26].mxu1 }
 0x14d   :  { %4570 = vst [vmem:[#allocation19_spill] sm:$0xff] %v4144_v12  ;;  %v4148_v28 = vadd.f32 %v429_v31, %v105_v48  ;;  %v431_v19 = vpop.f32.mrb[27].mxu1  ;;  %v764_v31 = vadd.f32 1.0, %v3704_v15  ;;  %v408_v12 = vadd.f32 %v407_v50, %v109_v52 }
 0x14e   :  { %4571 = vst [vmem:[#allocation20_spill] sm:$0xff] %v4146_v37  ;;  %v4150_v24 = vadd.f32 %v431_v19, %v109_v52  ;;  %v770_v37 = vadd.f32 1.0, %v3702_v10 }
 0x14f   :  { %4572 = vst [vmem:[#allocation21_spill] sm:$0xff] %v4148_v28  ;;  %v406_v28 = vadd.f32 %v405_v46, %v105_v48 }
 0x150   :  { %4573 = vst [vmem:[#allocation22_spill] sm:$0xff] %v4150_v24  ;;  %3705 = vrcp.f32 %v770_v37 }
 0x151   :  { %3707 = vrcp.f32 %v764_v31 }
 0x152   :  { %v435_v20 = vpop.f32.mrb[28].mxu1 }
 0x153   :  { %v4152_v16 = vadd.f32 %v435_v20, %v105_v48  ;;  %v437_v39 = vpop.f32.mrb[29].mxu1 }
 0x154   :  { %v4154_v35 = vadd.f32 %v437_v39, %v109_v52  ;;  %v439_v41 = vpop.f32.mrb[30].mxu1 }
 0x155   :  { %4574 = vst [vmem:[#allocation23_spill] sm:$0xff] %v4152_v16  ;;  %v4156_v44 = vadd.f32 %v439_v41, %v105_v48  ;;  %v441_v9 = vpop.f32.mrb[31].mxu1 }
 0x156   :  { %4575 = vst [vmem:[#allocation24_spill] sm:$0xff] %v4154_v35  ;;  %v4158_v27 = vadd.f32 %v441_v9, %v109_v52 }
 0x157   :  { %4576 = vst [vmem:[#allocation25_spill] sm:$0xff] %v4156_v44 }
 0x158   :  { %4577 = vst [vmem:[#allocation26_spill] sm:$0xff] %v4158_v27 }
 0x15a   :  { %v750_v19 = vpop.f32.mrb[32].mxu1  ;;  %v3706_v41 = vpop.eup %3705 }
 0x15b   :  { %v759_v24 = vadd.f32 %v750_v19, %v406_v28  ;;  %v752_v20 = vpop.f32.mrb[33].mxu1  ;;  %v3708_v44 = vpop.eup %3707  ;;  %v780_v9 = vmul.f32 0.0, %v3706_v41 }
 0x15c   :  { %v760_v16 = vadd.f32 %v752_v20, %v408_v12  ;;  %v754_v51 = vpop.f32.mrb[34].mxu1 }
 0x15d   :  { %3709 = vtanh.f32 %v759_v24  ;;  %v755_v39 = vpop.f32.mrb[35].mxu1 }
 0x15e   :  { %v3225_v35 = vmul.f32 -1.442695, %v760_v16  ;;  %v4578_v16 = vmov 0   ;;  %v4273_v39 = vld [vmem:[#allocation6 + $0xe0] ss:$16 sps:$4 sm:$0xff]  }
 0x160   :  { %3711 = vpow2.f32 %v3225_v35 }
 0x167   :  { %v3710_v42 = vpop.eup %3709 }
 0x168   :  { %v781_v27 = vmul.f32 %v3710_v42, %v3708_v44 }
 0x16a   :  { %v3712_v10 = vpop.eup %3711  ;;  %v4160_v15 = vadd.f32 %v781_v27, %v780_v9 }
 0x16b   :  { %v777_v46 = vadd.f32 1.0, %v3712_v10 }
 0x16c   :  { %3713 = vtanh.f32 %v4160_v15 }
 0x16d   :  { %3715 = vrcp.f32 %v777_v46 }
 0x176   :  { %v3714_v28 = vpop.eup %3713 }
 0x177   :  { %v3716_v37 = vpop.eup %3715 }
 0x178   :  { %v4163_v48 = vmul.f32 %v3716_v37, %v3714_v28 }
 0x17a   :  { %v793_v51 = vpack.c.bf16 %v4163_v48, %v4163_v48 }
 0x17c   :  { %1019 = vmatmul.mubr.bf16.vlgmr.msra.gmra.mrb[4].mxu0 %v793_v51  ;;  %1060 = vmatmul.mubr.bf16.vlgmr.msra.gmra.mrb[36].mxu1 %v793_v51 }
 0x17d   :  { %1299 = vmatpush1.bf16.msra.mxu0 %v3945_v4  ;;  %1340 = vmatpush1.bf16.msra.mxu1 %v4027_v54 }
 0x17e   :  { %1300 = vmatprep.subr.bf16.mxu0 %v3948_v7  ;;  %1341 = vmatprep.subr.bf16.mxu1 %v4030_v55 }
 0x17f   :  { %1330 = vmatprep.mubr.bf16.mxu0 %v4578_v16  ;;  %1371 = vmatprep.mubr.bf16.mxu1 %v4578_v16 }
 0x181   :  { %1301 = vmatpush1.bf16.msra.mxu0 %v3951_v8  ;;  %1342 = vmatpush1.bf16.msra.mxu1 %v4034_v56 }
 0x182   :  { %1302 = vmatprep.subr.bf16.mxu0 %v3954_v11  ;;  %1343 = vmatprep.subr.bf16.mxu1 %v4042_v57 }
 0x185   :  { %1303 = vmatpush1.bf16.msra.mxu0 %v3957_v13  ;;  %1344 = vmatpush1.bf16.msra.mxu1 %v4045_v58 }
 0x186   :  { %1304 = vmatprep.subr.bf16.mxu0 %v3960_v14  ;;  %1345 = vmatprep.subr.bf16.mxu1 %v4048_v59 }
 0x189   :  { %1305 = vmatpush1.bf16.msra.mxu0 %v3963_v17  ;;  %1346 = vmatpush1.bf16.msra.mxu1 %v4051_v60 }
 0x18a   :  { %1306 = vmatprep.subr.bf16.mxu0 %v3966_v18  ;;  %1347 = vmatprep.subr.bf16.mxu1 %v4055_v61 }
 0x18d   :  { %1307 = vmatpush1.bf16.msra.mxu0 %v3969_v21  ;;  %1348 = vmatpush1.bf16.msra.mxu1 %v4058_v62 }
 0x18e   :  { %1308 = vmatprep.subr.bf16.mxu0 %v3972_v22  ;;  %1349 = vmatprep.subr.bf16.mxu1 %v4061_v63 }
 0x191   :  { %1309 = vmatpush1.bf16.msra.mxu0 %v3975_v25  ;;  %1350 = vmatpush1.bf16.msra.mxu1 %v4064_v1 }
 0x192   :  { %1310 = vmatprep.subr.bf16.mxu0 %v3978_v26  ;;  %1351 = vmatprep.subr.bf16.mxu1 %v4068_v2 }
 0x195   :  { %1311 = vmatpush1.bf16.msra.mxu0 %v3981_v29  ;;  %1352 = vmatpush1.bf16.msra.mxu1 %v4071_v3 }
 0x196   :  { %1312 = vmatprep.subr.bf16.mxu0 %v3984_v30  ;;  %1353 = vmatprep.subr.bf16.mxu1 %v4074_v5 }
 0x199   :  { %1313 = vmatpush1.bf16.msra.mxu0 %v3987_v33  ;;  %1354 = vmatpush1.bf16.msra.mxu1 %v4077_v6 }
 0x19a   :  { %1651 = vmatprep.subr.bf16.mxu1 %v4023_v53 }
 0x24f   :  { %v1020_v4 = vpop.f32.mrb[4].mxu0  ;;  %v1061_v7 = vpop.f32.mrb[36].mxu1 }
 0x250   :  { %v1068_v8 = vadd.f32 %v1020_v4, %v4104_v34  ;;  %v1070_v11 = vadd.f32 %v1061_v7, %v4132_v23  ;;  %v1022_v13 = vpop.f32.mrb[5].mxu0  ;;  %v1063_v14 = vpop.f32.mrb[37].mxu1 }
 0x251   :  { %v1069_v17 = vadd.f32 %v1022_v13, %v4106_v38  ;;  %v1071_v18 = vadd.f32 %v1063_v14, %v4134_v0  ;;  %v1024_v21 = vpop.f32.mrb[6].mxu0  ;;  %v1065_v22 = vpop.f32.mrb[38].mxu1 }
 0x252   :  { %v3258_v25 = vmul.f32 -1.442695, %v1068_v8  ;;  %v1025_v26 = vpop.f32.mrb[7].mxu0  ;;  %v1066_v29 = vpop.f32.mrb[39].mxu1 }
 0x253   :  { %v3259_v30 = vmul.f32 -1.442695, %v1069_v17  ;;  %v3260_v33 = vmul.f32 -1.442695, %v1071_v18 }
 0x254   :  { %3717 = vpow2.f32 %v3258_v25 }
 0x255   :  { %3719 = vpow2.f32 %v3259_v30 }
 0x256   :  { %3721 = vpow2.f32 %v3260_v33 }
 0x257   :  { %3723 = vtanh.f32 %v1070_v11 }
 0x25e   :  { %v3718_v53 = vpop.eup %3717 }
 0x25f   :  { %v3720_v24 = vpop.eup %3719  ;;  %v1075_v34 = vadd.f32 1.0, %v3718_v53 }
 0x260   :  { %v1081_v50 = vadd.f32 1.0, %v3720_v24  ;;  %v3722_v38 = vpop.eup %3721 }
 0x261   :  { %3725 = vrcp.f32 %v1075_v34  ;;  %v3724_v52 = vpop.eup %3723  ;;  %v1088_v12 = vadd.f32 1.0, %v3722_v38  ;;  %v4308_v38 = vld [vmem:[#allocation6 + $0xc] ss:$16 sps:$4 sm:$0xff]  }
 0x262   :  { %3727 = vrcp.f32 %v1081_v50 }
 0x263   :  { %3729 = vrcp.f32 %v1088_v12  ;;  %v4322_v12 = vld [vmem:[#allocation6 + $0x48] ss:$16 sps:$4 sm:$0xff]  }
 0x26b   :  { %v3726_v0 = vpop.eup %3725 }
 0x26c   :  { %v3728_v23 = vpop.eup %3727  ;;  %v1092_v42 = vmul.f32 %v3726_v0, %v3724_v52  ;;  %v4310_v52 = vld [vmem:[#allocation6 + $0x8] ss:$16 sps:$4 sm:$0xff]   ;;  %v4314_v0 = vld [vmem:[#allocation6 + $0x2c] ss:$16 sps:$4 sm:$0xff]  }
 0x26d   :  { %v1091_v35 = vmul.f32 %v3728_v23, %v4160_v15  ;;  %v3730_v27 = vpop.eup %3729  ;;  %v4316_v23 = vld [vmem:[#allocation6 + $0x28] ss:$16 sps:$4 sm:$0xff]  }
 0x26f   :  { %v4205_v44 = vadd.f32 %v1092_v42, %v1091_v35  ;;  %v4320_v42 = vld [vmem:[#allocation6 + $0x4c] ss:$16 sps:$4 sm:$0xff]  }
 0x270   :  { %v4326_v35 = vld [vmem:[#allocation6 + $0x6c] ss:$16 sps:$4 sm:$0xff]  }
 0x271   :  { %3731 = vtanh.f32 %v4205_v44 }
 0x27b   :  { %v3732_v31 = vpop.eup %3731 }
 0x27c   :  { %v4208_v19 = vmul.f32 %v3732_v31, %v3730_v27  ;;  %v4332_v27 = vld [vmem:[#allocation6 + $0x8c] ss:$16 sps:$4 sm:$0xff]   ;;  %v4334_v31 = vld [vmem:[#allocation6 + $0x88] ss:$16 sps:$4 sm:$0xff]  }
 0x27e   :  { %v1105_v20 = vpack.c.bf16 %v4208_v19, %v4208_v19 }
 0x280   :  { %1331 = vmatmul.mubr.bf16.vlgmr.msra.gmra.mrb[8].mxu0 %v1105_v20  ;;  %1372 = vmatmul.mubr.bf16.vlgmr.msra.gmra.mrb[40].mxu1 %v1105_v20  ;;  %v4337_v20 = vld [vmem:[#allocation6 + $0xac] ss:$16 sps:$4 sm:$0xff]  }
 0x281   :  { %1652 = vmatpush1.bf16.msra.mxu1 %v4027_v54  ;;  %1642 = vmatprep.mubr.bf16.mxu0 %v4578_v16  ;;  %v4229_v54 = vld [vmem:[#allocation6 + $0x4] ss:$16 sps:$4 sm:$0xff]  }
 0x282   :  { %1653 = vmatprep.subr.bf16.mxu1 %v4030_v55  ;;  %1683 = vmatprep.mubr.bf16.mxu1 %v4578_v16  ;;  %v4231_v55 = vld [vmem:[#allocation6] ss:$16 sps:$4 sm:$0xff]  }
 0x283   :  { %1610 = vmatprep.subr.bf16.mxu0 %v4229_v54 }
 0x284   :  { %1611 = vmatpush1.bf16.msra.mxu0 %v4231_v55 }
 0x285   :  { %1654 = vmatpush1.bf16.msra.mxu1 %v4034_v56  ;;  %v4235_v56 = vld [vmem:[#allocation6 + $0x24] ss:$16 sps:$4 sm:$0xff]  }
 0x286   :  { %1655 = vmatprep.subr.bf16.mxu1 %v4042_v57  ;;  %v4237_v57 = vld [vmem:[#allocation6 + $0x20] ss:$16 sps:$4 sm:$0xff]   ;;  %1612 = vmatprep.subr.bf16.mxu0 %v4235_v56 }
 0x288   :  { %1613 = vmatpush1.bf16.msra.mxu0 %v4237_v57 }
 0x289   :  { %1656 = vmatpush1.bf16.msra.mxu1 %v4045_v58  ;;  %v4241_v58 = vld [vmem:[#allocation6 + $0x44] ss:$16 sps:$4 sm:$0xff]  }
 0x28a   :  { %1657 = vmatprep.subr.bf16.mxu1 %v4048_v59  ;;  %v4243_v59 = vld [vmem:[#allocation6 + $0x40] ss:$16 sps:$4 sm:$0xff]   ;;  %1614 = vmatprep.subr.bf16.mxu0 %v4241_v58 }
 0x28c   :  { %1615 = vmatpush1.bf16.msra.mxu0 %v4243_v59 }
 0x28d   :  { %1658 = vmatpush1.bf16.msra.mxu1 %v4051_v60  ;;  %v4247_v60 = vld [vmem:[#allocation6 + $0x64] ss:$16 sps:$4 sm:$0xff]  }
 0x28e   :  { %1659 = vmatprep.subr.bf16.mxu1 %v4055_v61  ;;  %v4249_v61 = vld [vmem:[#allocation6 + $0x60] ss:$16 sps:$4 sm:$0xff]   ;;  %1616 = vmatprep.subr.bf16.mxu0 %v4247_v60 }
 0x290   :  { %1617 = vmatpush1.bf16.msra.mxu0 %v4249_v61 }
 0x291   :  { %1660 = vmatpush1.bf16.msra.mxu1 %v4058_v62  ;;  %v4253_v62 = vld [vmem:[#allocation6 + $0x84] ss:$16 sps:$4 sm:$0xff]  }
 0x292   :  { %1661 = vmatprep.subr.bf16.mxu1 %v4061_v63  ;;  %v4255_v63 = vld [vmem:[#allocation6 + $0x80] ss:$16 sps:$4 sm:$0xff]   ;;  %1618 = vmatprep.subr.bf16.mxu0 %v4253_v62 }
 0x294   :  { %1619 = vmatpush1.bf16.msra.mxu0 %v4255_v63 }
 0x295   :  { %1662 = vmatpush1.bf16.msra.mxu1 %v4064_v1  ;;  %v4258_v1 = vld [vmem:[#allocation6 + $0xa4] ss:$16 sps:$4 sm:$0xff]  }
 0x296   :  { %1663 = vmatprep.subr.bf16.mxu1 %v4068_v2  ;;  %v4261_v2 = vld [vmem:[#allocation6 + $0xa0] ss:$16 sps:$4 sm:$0xff]   ;;  %1620 = vmatprep.subr.bf16.mxu0 %v4258_v1 }
 0x298   :  { %1621 = vmatpush1.bf16.msra.mxu0 %v4261_v2 }
 0x299   :  { %1664 = vmatpush1.bf16.msra.mxu1 %v4071_v3  ;;  %v4264_v3 = vld [vmem:[#allocation6 + $0xc4] ss:$16 sps:$4 sm:$0xff]  }
 0x29a   :  { %1665 = vmatprep.subr.bf16.mxu1 %v4074_v5  ;;  %v4267_v5 = vld [vmem:[#allocation6 + $0xc0] ss:$16 sps:$4 sm:$0xff]   ;;  %1622 = vmatprep.subr.bf16.mxu0 %v4264_v3 }
 0x29c   :  { %1623 = vmatpush1.bf16.msra.mxu0 %v4267_v5 }
 0x29d   :  { %1666 = vmatpush1.bf16.msra.mxu1 %v4077_v6  ;;  %v4270_v6 = vld [vmem:[#allocation6 + $0xe4] ss:$16 sps:$4 sm:$0xff]  }
 0x29e   :  { %1624 = vmatprep.subr.bf16.mxu0 %v4270_v6  ;;  %1963 = vmatprep.subr.bf16.mxu1 %v4308_v38 }
 0x2a0   :  { %1625 = vmatpush1.bf16.msra.mxu0 %v4273_v39 }
 0x2a1   :  { %1922 = vmatprep.subr.bf16.mxu0 %v4229_v54 }
 0x353   :  { %v1332_v41 = vpop.f32.mrb[8].mxu0  ;;  %v1373_v9 = vpop.f32.mrb[40].mxu1 }
 0x354   :  { %v1380_v10 = vadd.f32 %v1332_v41, %v4108_v43  ;;  %v1382_v15 = vadd.f32 %v1373_v9, %v4136_v32  ;;  %v1334_v46 = vpop.f32.mrb[9].mxu0  ;;  %v1375_v28 = vpop.f32.mrb[41].mxu1  ;;  %v4340_v41 = vld [vmem:[#allocation6 + $0xa8] ss:$16 sps:$4 sm:$0xff]   ;;  %v4343_v9 = vld [vmem:[#allocation6 + $0xcc] ss:$16 sps:$4 sm:$0xff]  }
 0x355   :  { %v1381_v37 = vadd.f32 %v1334_v46, %v4110_v45  ;;  %v1383_v51 = vadd.f32 %v1375_v28, %v4138_v36  ;;  %v1336_v4 = vpop.f32.mrb[10].mxu0  ;;  %v1377_v7 = vpop.f32.mrb[42].mxu1  ;;  %v4352_v46 = vld [vmem:[#allocation6 + $0xe8] ss:$16 sps:$4 sm:$0xff]  }
 0x356   :  { %v3293_v8 = vmul.f32 -1.442695, %v1380_v10  ;;  %v1337_v11 = vpop.f32.mrb[11].mxu0  ;;  %v1378_v13 = vpop.f32.mrb[43].mxu1  ;;  %v4346_v10 = vld [vmem:[#allocation6 + $0xc8] ss:$16 sps:$4 sm:$0xff]  }
 0x357   :  { %v3294_v14 = vmul.f32 -1.442695, %v1381_v37  ;;  %v3295_v17 = vmul.f32 -1.442695, %v1383_v51  ;;  %v4579_v13 = vld [vmem:[#allocation18_spill] sm:$0xff] }
 0x358   :  { %3733 = vpow2.f32 %v3293_v8 }
 0x359   :  { %3735 = vpow2.f32 %v3294_v14 }
 0x35a   :  { %3737 = vpow2.f32 %v3295_v17 }
 0x35b   :  { %3739 = vtanh.f32 %v1382_v15  ;;  %v4349_v15 = vld [vmem:[#allocation6 + $0xec] ss:$16 sps:$4 sm:$0xff]  }
 0x362   :  { %v3734_v18 = vpop.eup %3733 }
 0x363   :  { %v3736_v21 = vpop.eup %3735  ;;  %v1387_v43 = vadd.f32 1.0, %v3734_v18 }
 0x364   :  { %v1393_v32 = vadd.f32 1.0, %v3736_v21  ;;  %v3738_v45 = vpop.eup %3737 }
 0x365   :  { %3741 = vrcp.f32 %v1387_v43  ;;  %v3740_v22 = vpop.eup %3739  ;;  %v1400_v29 = vadd.f32 1.0, %v3738_v45 }
 0x366   :  { %3743 = vrcp.f32 %v1393_v32 }
 0x367   :  { %3745 = vrcp.f32 %v1400_v29 }
 0x36f   :  { %v3742_v36 = vpop.eup %3741 }
 0x370   :  { %v3744_v25 = vpop.eup %3743  ;;  %v1404_v26 = vmul.f32 %v3742_v36, %v3740_v22 }
 0x371   :  { %v1403_v30 = vmul.f32 %v3744_v25, %v4205_v44  ;;  %v3746_v53 = vpop.eup %3745  ;;  %v4328_v44 = vld [vmem:[#allocation6 + $0x68] ss:$16 sps:$4 sm:$0xff]  }
 0x373   :  { %v4283_v33 = vadd.f32 %v1404_v26, %v1403_v30 }
 0x375   :  { %3747 = vtanh.f32 %v4283_v33 }
 0x37f   :  { %v3748_v24 = vpop.eup %3747 }
 0x380   :  { %v4286_v34 = vmul.f32 %v3748_v24, %v3746_v53 }
 0x382   :  { %v1417_v50 = vpack.c.bf16 %v4286_v34, %v4286_v34 }
 0x384   :  { %1643 = vmatmul.mubr.bf16.vlgmr.msra.gmra.mrb[12].mxu0 %v1417_v50  ;;  %1684 = vmatmul.mubr.bf16.vlgmr.msra.gmra.mrb[44].mxu1 %v1417_v50 }
 0x385   :  { %1923 = vmatpush1.bf16.msra.mxu0 %v4231_v55  ;;  %1954 = vmatprep.mubr.bf16.mxu0 %v4578_v16 }
 0x386   :  { %1924 = vmatprep.subr.bf16.mxu0 %v4235_v56  ;;  %1995 = vmatprep.mubr.bf16.mxu1 %v4578_v16 }
 0x387   :  { %1964 = vmatpush1.bf16.msra.mxu1 %v4310_v52 }
 0x388   :  { %1965 = vmatprep.subr.bf16.mxu1 %v4314_v0 }
 0x389   :  { %1925 = vmatpush1.bf16.msra.mxu0 %v4237_v57 }
 0x38a   :  { %1926 = vmatprep.subr.bf16.mxu0 %v4241_v58 }
 0x38b   :  { %1966 = vmatpush1.bf16.msra.mxu1 %v4316_v23 }
 0x38c   :  { %1967 = vmatprep.subr.bf16.mxu1 %v4320_v42 }
 0x38d   :  { %1927 = vmatpush1.bf16.msra.mxu0 %v4243_v59 }
 0x38e   :  { %1928 = vmatprep.subr.bf16.mxu0 %v4247_v60 }
 0x38f   :  { %1968 = vmatpush1.bf16.msra.mxu1 %v4322_v12 }
 0x390   :  { %1969 = vmatprep.subr.bf16.mxu1 %v4326_v35 }
 0x391   :  { %1929 = vmatpush1.bf16.msra.mxu0 %v4249_v61 }
 0x392   :  { %1930 = vmatprep.subr.bf16.mxu0 %v4253_v62 }
 0x393   :  { %1970 = vmatpush1.bf16.msra.mxu1 %v4328_v44 }
 0x394   :  { %1971 = vmatprep.subr.bf16.mxu1 %v4332_v27 }
 0x395   :  { %1931 = vmatpush1.bf16.msra.mxu0 %v4255_v63 }
 0x396   :  { %1932 = vmatprep.subr.bf16.mxu0 %v4258_v1 }
 0x397   :  { %1972 = vmatpush1.bf16.msra.mxu1 %v4334_v31 }
 0x398   :  { %1973 = vmatprep.subr.bf16.mxu1 %v4337_v20 }
 0x399   :  { %1933 = vmatpush1.bf16.msra.mxu0 %v4261_v2 }
 0x39a   :  { %1934 = vmatprep.subr.bf16.mxu0 %v4264_v3 }
 0x39b   :  { %1974 = vmatpush1.bf16.msra.mxu1 %v4340_v41 }
 0x39c   :  { %1975 = vmatprep.subr.bf16.mxu1 %v4343_v9 }
 0x39d   :  { %1935 = vmatpush1.bf16.msra.mxu0 %v4267_v5 }
 0x39e   :  { %1936 = vmatprep.subr.bf16.mxu0 %v4270_v6 }
 0x39f   :  { %1976 = vmatpush1.bf16.msra.mxu1 %v4346_v10 }
 0x3a0   :  { %1977 = vmatprep.subr.bf16.mxu1 %v4349_v15 }
 0x3a1   :  { %1937 = vmatpush1.bf16.msra.mxu0 %v4273_v39 }
 0x3a2   :  { %2234 = vmatprep.subr.bf16.mxu0 %v4229_v54 }
 0x3a3   :  { %1978 = vmatpush1.bf16.msra.mxu1 %v4352_v46 }
 0x3a4   :  { %2275 = vmatprep.subr.bf16.mxu1 %v4308_v38 }
 0x457   :  { %v1644_v28 = vpop.f32.mrb[12].mxu0  ;;  %v1685_v37 = vpop.f32.mrb[44].mxu1 }
 0x458   :  { %v1692_v51 = vadd.f32 %v1644_v28, %v4112_v47  ;;  %v1694_v4 = vadd.f32 %v1685_v37, %v4140_v40  ;;  %v1646_v7 = vpop.f32.mrb[13].mxu0  ;;  %v1687_v8 = vpop.f32.mrb[45].mxu1 }
 0x459   :  { %v1693_v11 = vadd.f32 %v1646_v7, %v4114_v49  ;;  %v1695_v14 = vadd.f32 %v1687_v8, %v4579_v13  ;;  %v1648_v17 = vpop.f32.mrb[14].mxu0  ;;  %v1689_v18 = vpop.f32.mrb[46].mxu1 }
 0x45a   :  { %v3328_v21 = vmul.f32 -1.442695, %v1692_v51  ;;  %v1649_v43 = vpop.f32.mrb[15].mxu0  ;;  %v1690_v32 = vpop.f32.mrb[47].mxu1 }
 0x45b   :  { %v3329_v45 = vmul.f32 -1.442695, %v1693_v11  ;;  %v3330_v22 = vmul.f32 -1.442695, %v1695_v14  ;;  %v4580_v11 = vld [vmem:[#allocation10_spill] sm:$0xff]  ;;  %v4581_v14 = vld [vmem:[#allocation19_spill] sm:$0xff] }
 0x45c   :  { %3749 = vpow2.f32 %v3328_v21  ;;  %v4582_v43 = vld [vmem:[#allocation11_spill] sm:$0xff] }
 0x45d   :  { %3751 = vpow2.f32 %v3329_v45  ;;  %v4583_v45 = vld [vmem:[#allocation20_spill] sm:$0xff] }
 0x45e   :  { %3753 = vpow2.f32 %v3330_v22 }
 0x45f   :  { %3755 = vtanh.f32 %v1694_v4 }
 0x466   :  { %v3750_v36 = vpop.eup %3749 }
 0x467   :  { %v3752_v25 = vpop.eup %3751  ;;  %v1699_v47 = vadd.f32 1.0, %v3750_v36 }
 0x468   :  { %v1705_v40 = vadd.f32 1.0, %v3752_v25  ;;  %v3754_v49 = vpop.eup %3753 }
 0x469   :  { %3757 = vrcp.f32 %v1699_v47  ;;  %v3756_v26 = vpop.eup %3755  ;;  %v1712_v24 = vadd.f32 1.0, %v3754_v49 }
 0x46a   :  { %3759 = vrcp.f32 %v1705_v40 }
 0x46b   :  { %3761 = vrcp.f32 %v1712_v24 }
 0x473   :  { %v3758_v29 = vpop.eup %3757 }
 0x474   :  { %v3760_v30 = vpop.eup %3759  ;;  %v1716_v53 = vmul.f32 %v3758_v29, %v3756_v26 }
 0x475   :  { %v1715_v50 = vmul.f32 %v3760_v30, %v4283_v33  ;;  %v3762_v37 = vpop.eup %3761 }
 0x477   :  { %v4362_v28 = vadd.f32 %v1716_v53, %v1715_v50 }
 0x479   :  { %3763 = vtanh.f32 %v4362_v28 }
 0x483   :  { %v3764_v51 = vpop.eup %3763 }
 0x484   :  { %v4365_v7 = vmul.f32 %v3764_v51, %v3762_v37 }
 0x486   :  { %v1729_v4 = vpack.c.bf16 %v4365_v7, %v4365_v7 }
 0x488   :  { %1955 = vmatmul.mubr.bf16.vlgmr.msra.gmra.mrb[16].mxu0 %v1729_v4  ;;  %1996 = vmatmul.mubr.bf16.vlgmr.msra.gmra.mrb[48].mxu1 %v1729_v4 }
 0x489   :  { %2235 = vmatpush1.bf16.msra.mxu0 %v4231_v55  ;;  %2276 = vmatpush1.bf16.msra.mxu1 %v4310_v52 }
 0x48a   :  { %2236 = vmatprep.subr.bf16.mxu0 %v4235_v56  ;;  %2277 = vmatprep.subr.bf16.mxu1 %v4314_v0 }
 0x48b   :  { %2266 = vmatprep.mubr.bf16.mxu0 %v4578_v16  ;;  %2307 = vmatprep.mubr.bf16.mxu1 %v4578_v16 }
 0x48d   :  { %2237 = vmatpush1.bf16.msra.mxu0 %v4237_v57  ;;  %2278 = vmatpush1.bf16.msra.mxu1 %v4316_v23 }
 0x48e   :  { %2238 = vmatprep.subr.bf16.mxu0 %v4241_v58  ;;  %2279 = vmatprep.subr.bf16.mxu1 %v4320_v42 }
 0x491   :  { %2239 = vmatpush1.bf16.msra.mxu0 %v4243_v59  ;;  %2280 = vmatpush1.bf16.msra.mxu1 %v4322_v12 }
 0x492   :  { %2240 = vmatprep.subr.bf16.mxu0 %v4247_v60  ;;  %2281 = vmatprep.subr.bf16.mxu1 %v4326_v35 }
 0x495   :  { %2241 = vmatpush1.bf16.msra.mxu0 %v4249_v61  ;;  %2282 = vmatpush1.bf16.msra.mxu1 %v4328_v44 }
 0x496   :  { %2242 = vmatprep.subr.bf16.mxu0 %v4253_v62  ;;  %2283 = vmatprep.subr.bf16.mxu1 %v4332_v27 }
 0x499   :  { %2243 = vmatpush1.bf16.msra.mxu0 %v4255_v63  ;;  %2284 = vmatpush1.bf16.msra.mxu1 %v4334_v31 }
 0x49a   :  { %2244 = vmatprep.subr.bf16.mxu0 %v4258_v1  ;;  %2285 = vmatprep.subr.bf16.mxu1 %v4337_v20 }
 0x49d   :  { %2245 = vmatpush1.bf16.msra.mxu0 %v4261_v2  ;;  %2286 = vmatpush1.bf16.msra.mxu1 %v4340_v41 }
 0x49e   :  { %2246 = vmatprep.subr.bf16.mxu0 %v4264_v3  ;;  %2287 = vmatprep.subr.bf16.mxu1 %v4343_v9 }
 0x4a1   :  { %2247 = vmatpush1.bf16.msra.mxu0 %v4267_v5  ;;  %2288 = vmatpush1.bf16.msra.mxu1 %v4346_v10 }
 0x4a2   :  { %2248 = vmatprep.subr.bf16.mxu0 %v4270_v6  ;;  %2289 = vmatprep.subr.bf16.mxu1 %v4349_v15 }
 0x4a5   :  { %2249 = vmatpush1.bf16.msra.mxu0 %v4273_v39  ;;  %2290 = vmatpush1.bf16.msra.mxu1 %v4352_v46 }
 0x4a6   :  { %2546 = vmatprep.subr.bf16.mxu0 %v4229_v54  ;;  %2587 = vmatprep.subr.bf16.mxu1 %v4308_v38 }
 0x55b   :  { %v1956_v33 = vpop.f32.mrb[16].mxu0  ;;  %v1997_v8 = vpop.f32.mrb[48].mxu1 }
 0x55c   :  { %v2004_v13 = vadd.f32 %v1956_v33, %v4580_v11  ;;  %v2006_v17 = vadd.f32 %v1997_v8, %v4581_v14  ;;  %v1958_v18 = vpop.f32.mrb[17].mxu0  ;;  %v1999_v21 = vpop.f32.mrb[49].mxu1 }
 0x55d   :  { %v2005_v32 = vadd.f32 %v1958_v18, %v4582_v43  ;;  %v2007_v22 = vadd.f32 %v1999_v21, %v4583_v45  ;;  %v1960_v36 = vpop.f32.mrb[18].mxu0  ;;  %v2001_v25 = vpop.f32.mrb[50].mxu1 }
 0x55e   :  { %v3363_v47 = vmul.f32 -1.442695, %v2004_v13  ;;  %v1961_v40 = vpop.f32.mrb[19].mxu0  ;;  %v2002_v49 = vpop.f32.mrb[51].mxu1 }
 0x55f   :  { %v3364_v54 = vmul.f32 -1.442695, %v2005_v32  ;;  %v3365_v26 = vmul.f32 -1.442695, %v2007_v22 }
 0x560   :  { %3765 = vpow2.f32 %v3363_v47 }
 0x561   :  { %3767 = vpow2.f32 %v3364_v54 }
 0x562   :  { %3769 = vpow2.f32 %v3365_v26 }
 0x563   :  { %3771 = vtanh.f32 %v2006_v17 }
 0x56a   :  { %v3766_v29 = vpop.eup %3765 }
 0x56b   :  { %v3768_v30 = vpop.eup %3767  ;;  %v2011_v53 = vadd.f32 1.0, %v3766_v29 }
 0x56c   :  { %v2017_v24 = vadd.f32 1.0, %v3768_v30  ;;  %v3770_v50 = vpop.eup %3769 }
 0x56d   :  { %3773 = vrcp.f32 %v2011_v53  ;;  %v3772_v37 = vpop.eup %3771  ;;  %v2024_v8 = vadd.f32 1.0, %v3770_v50 }
 0x56e   :  { %3775 = vrcp.f32 %v2017_v24 }
 0x56f   :  { %3777 = vrcp.f32 %v2024_v8 }
 0x577   :  { %v3774_v51 = vpop.eup %3773 }
 0x578   :  { %v3776_v4 = vpop.eup %3775  ;;  %v2028_v33 = vmul.f32 %v3774_v51, %v3772_v37 }
 0x579   :  { %v2027_v11 = vmul.f32 %v3776_v4, %v4362_v28  ;;  %v3778_v14 = vpop.eup %3777  ;;  %v3693_v4 = vld [vmem:[%s4556_s4] sm:$0xff]  }
 0x57b   :  { %v4408_v13 = vadd.f32 %v2028_v33, %v2027_v11  ;;  %v4588_v11 = vld [vmem:[#allocation14_spill] sm:$0xff] }
 0x57d   :  { %3779 = vtanh.f32 %v4408_v13 }
 0x587   :  { %v3780_v18 = vpop.eup %3779 }
 0x588   :  { %v4411_v21 = vmul.f32 %v3780_v18, %v3778_v14  ;;  %v4589_v14 = vld [vmem:[#allocation23_spill] sm:$0xff] }
 0x58a   :  { %v2041_v17 = vpack.c.bf16 %v4411_v21, %v4411_v21 }
 0x58c   :  { %2267 = vmatmul.mubr.bf16.vlgmr.msra.gmra.mrb[20].mxu0 %v2041_v17  ;;  %2308 = vmatmul.mubr.bf16.vlgmr.msra.gmra.mrb[52].mxu1 %v2041_v17 }
 0x58d   :  { %2547 = vmatpush1.bf16.msra.mxu0 %v4231_v55  ;;  %2588 = vmatpush1.bf16.msra.mxu1 %v4310_v52 }
 0x58e   :  { %2548 = vmatprep.subr.bf16.mxu0 %v4235_v56  ;;  %2589 = vmatprep.subr.bf16.mxu1 %v4314_v0 }
 0x58f   :  { %2578 = vmatprep.mubr.bf16.mxu0 %v4578_v16  ;;  %2619 = vmatprep.mubr.bf16.mxu1 %v4578_v16 }
 0x591   :  { %2549 = vmatpush1.bf16.msra.mxu0 %v4237_v57  ;;  %2590 = vmatpush1.bf16.msra.mxu1 %v4316_v23  ;;  %v4584_v57 = vld [vmem:[#allocation12_spill] sm:$0xff] }
 0x592   :  { %2550 = vmatprep.subr.bf16.mxu0 %v4241_v58  ;;  %2591 = vmatprep.subr.bf16.mxu1 %v4320_v42 }
 0x595   :  { %2551 = vmatpush1.bf16.msra.mxu0 %v4243_v59  ;;  %2592 = vmatpush1.bf16.msra.mxu1 %v4322_v12  ;;  %v4585_v59 = vld [vmem:[#allocation21_spill] sm:$0xff] }
 0x596   :  { %2552 = vmatprep.subr.bf16.mxu0 %v4247_v60  ;;  %2593 = vmatprep.subr.bf16.mxu1 %v4326_v35 }
 0x599   :  { %2553 = vmatpush1.bf16.msra.mxu0 %v4249_v61  ;;  %2594 = vmatpush1.bf16.msra.mxu1 %v4328_v44 }
 0x59a   :  { %2554 = vmatprep.subr.bf16.mxu0 %v4253_v62  ;;  %2595 = vmatprep.subr.bf16.mxu1 %v4332_v27 }
 0x59d   :  { %2555 = vmatpush1.bf16.msra.mxu0 %v4255_v63  ;;  %2596 = vmatpush1.bf16.msra.mxu1 %v4334_v31  ;;  %v4586_v63 = vld [vmem:[#allocation13_spill] sm:$0xff] }
 0x59e   :  { %2556 = vmatprep.subr.bf16.mxu0 %v4258_v1  ;;  %2597 = vmatprep.subr.bf16.mxu1 %v4337_v20 }
 0x5a1   :  { %2557 = vmatpush1.bf16.msra.mxu0 %v4261_v2  ;;  %2598 = vmatpush1.bf16.msra.mxu1 %v4340_v41  ;;  %v4587_v2 = vld [vmem:[#allocation22_spill] sm:$0xff] }
 0x5a2   :  { %2558 = vmatprep.subr.bf16.mxu0 %v4264_v3  ;;  %2599 = vmatprep.subr.bf16.mxu1 %v4343_v9 }
 0x5a5   :  { %2559 = vmatpush1.bf16.msra.mxu0 %v4267_v5  ;;  %2600 = vmatpush1.bf16.msra.mxu1 %v4346_v10 }
 0x5a6   :  { %2560 = vmatprep.subr.bf16.mxu0 %v4270_v6  ;;  %2601 = vmatprep.subr.bf16.mxu1 %v4349_v15 }
 0x5a9   :  { %2561 = vmatpush1.bf16.msra.mxu0 %v4273_v39  ;;  %2602 = vmatpush1.bf16.msra.mxu1 %v4352_v46 }
 0x5aa   :  { %2899 = vmatprep.subr.bf16.mxu1 %v4308_v38 }
 0x65f   :  { %v2268_v55 = vpop.f32.mrb[20].mxu0  ;;  %v2309_v56 = vpop.f32.mrb[52].mxu1 }
 0x660   :  { %v2316_v58 = vadd.f32 %v2268_v55, %v4584_v57  ;;  %v2318_v60 = vadd.f32 %v2309_v56, %v4585_v59  ;;  %v2270_v61 = vpop.f32.mrb[21].mxu0  ;;  %v2311_v62 = vpop.f32.mrb[53].mxu1  ;;  %v4590_v56 = vld [vmem:[#allocation15_spill] sm:$0xff] }
 0x661   :  { %v2317_v1 = vadd.f32 %v2270_v61, %v4586_v63  ;;  %v2319_v3 = vadd.f32 %v2311_v62, %v4587_v2  ;;  %v2272_v5 = vpop.f32.mrb[22].mxu0  ;;  %v2313_v6 = vpop.f32.mrb[54].mxu1 }
 0x662   :  { %v3398_v28 = vmul.f32 -1.442695, %v2316_v58  ;;  %v2273_v39 = vpop.f32.mrb[23].mxu0  ;;  %v2314_v43 = vpop.f32.mrb[55].mxu1  ;;  %v4591_v58 = vld [vmem:[#allocation24_spill] sm:$0xff] }
 0x663   :  { %v3399_v32 = vmul.f32 -1.442695, %v2317_v1  ;;  %v3400_v38 = vmul.f32 -1.442695, %v2319_v3 }
 0x664   :  { %3781 = vpow2.f32 %v3398_v28 }
 0x665   :  { %3783 = vpow2.f32 %v3399_v32 }
 0x666   :  { %3785 = vpow2.f32 %v3400_v38 }
 0x667   :  { %3787 = vtanh.f32 %v2318_v60 }
 0x66e   :  { %v3782_v45 = vpop.eup %3781 }
 0x66f   :  { %v3784_v22 = vpop.eup %3783  ;;  %v2323_v36 = vadd.f32 1.0, %v3782_v45 }
 0x670   :  { %v2329_v25 = vadd.f32 1.0, %v3784_v22  ;;  %v3786_v47 = vpop.eup %3785 }
 0x671   :  { %3789 = vrcp.f32 %v2323_v36  ;;  %v3788_v40 = vpop.eup %3787  ;;  %v2336_v29 = vadd.f32 1.0, %v3786_v47 }
 0x672   :  { %3791 = vrcp.f32 %v2329_v25 }
 0x673   :  { %3793 = vrcp.f32 %v2336_v29  ;;  %v3694_v29 = vld [vmem:[%s4556_s4 + $0x8] sm:$0xff]  }
 0x67b   :  { %v3790_v49 = vpop.eup %3789 }
 0x67c   :  { %v3792_v54 = vpop.eup %3791  ;;  %v2340_v26 = vmul.f32 %v3790_v49, %v3788_v40 }
 0x67d   :  { %v2339_v30 = vmul.f32 %v3792_v54, %v4408_v13  ;;  %v3794_v24 = vpop.eup %3793 }
 0x67f   :  { %v4453_v53 = vadd.f32 %v2340_v26, %v2339_v30  ;;  %v2978_v30 = vpack.c.bf16 %v4208_v19, %v4163_v48  ;;  %v3697_v48 = vld [vmem:[%s4556_s4 + $0x20] sm:$0xff]   ;;  %v3698_v19 = vld [vmem:[%s4556_s4 + $0x28] sm:$0xff]  }
 0x681   :  { %3795 = vtanh.f32 %v4453_v53 }
 0x68b   :  { %v3796_v50 = vpop.eup %3795 }
 0x68c   :  { %v4456_v37 = vmul.f32 %v3796_v50, %v3794_v24  ;;  %v3696_v24 = vld [vmem:[%s4556_s4 + $0x18] sm:$0xff]   ;;  %v3699_v50 = vld [vmem:[%s4556_s4 + $0x30] sm:$0xff]  }
 0x68e   :  { %v2353_v51 = vpack.c.bf16 %v4456_v37, %v4456_v37 }
 0x690   :  { %2579 = vmatmul.mubr.bf16.vlgmr.msra.gmra.mrb[24].mxu0 %v2353_v51  ;;  %2620 = vmatmul.mubr.bf16.vlgmr.msra.gmra.mrb[56].mxu1 %v2353_v51  ;;  %v3700_v51 = vld [vmem:[%s4556_s4 + $0x38] sm:$0xff]  }
 0x691   :  { %2900 = vmatpush1.bf16.msra.mxu1 %v4310_v52  ;;  %2890 = vmatprep.mubr.bf16.mxu0 %v4578_v16  ;;  %v3669_v52 = vld [vmem:[#allocation6] ss:$16 sps:$4 sm:$0xff]  }
 0x692   :  { %2901 = vmatprep.subr.bf16.mxu1 %v4314_v0  ;;  %2931 = vmatprep.mubr.bf16.mxu1 %v4578_v16  ;;  %v3671_v16 = vld [vmem:[#allocation6 + $0x4] ss:$16 sps:$4 sm:$0xff]  }
 0x693   :  { %2858 = vmatprep.subr.bf16.mxu0 %v3671_v16  ;;  %v3674_v0 = vld [vmem:[#allocation6 + $0x24] ss:$16 sps:$4 sm:$0xff]   ;;  %v2979_v16 = vpack.c.bf16 %v4365_v7, %v4286_v34 }
 0x694   :  { %2859 = vmatpush1.bf16.msra.mxu0 %v3669_v52  ;;  %v2980_v52 = vpack.c.bf16 %v4456_v37, %v4411_v21 }
 0x695   :  { %2902 = vmatpush1.bf16.msra.mxu1 %v4316_v23  ;;  %v3672_v23 = vld [vmem:[#allocation6 + $0x20] ss:$16 sps:$4 sm:$0xff]   ;;  %2860 = vmatprep.subr.bf16.mxu0 %v3674_v0 }
 0x696   :  { %2903 = vmatprep.subr.bf16.mxu1 %v4320_v42  ;;  %v3677_v42 = vld [vmem:[#allocation6 + $0x44] ss:$16 sps:$4 sm:$0xff]  }
 0x698   :  { %2861 = vmatpush1.bf16.msra.mxu0 %v3672_v23 }
 0x699   :  { %2904 = vmatpush1.bf16.msra.mxu1 %v4322_v12  ;;  %v3675_v12 = vld [vmem:[#allocation6 + $0x40] ss:$16 sps:$4 sm:$0xff]   ;;  %2862 = vmatprep.subr.bf16.mxu0 %v3677_v42 }
 0x69a   :  { %2905 = vmatprep.subr.bf16.mxu1 %v4326_v35  ;;  %v3680_v35 = vld [vmem:[#allocation6 + $0x64] ss:$16 sps:$4 sm:$0xff]  }
 0x69b   :  { %v4592_v42 = vld [vmem:[#allocation16_spill] sm:$0xff] }
 0x69c   :  { %2863 = vmatpush1.bf16.msra.mxu0 %v3675_v12 }
 0x69d   :  { %2906 = vmatpush1.bf16.msra.mxu1 %v4328_v44  ;;  %v3678_v44 = vld [vmem:[#allocation6 + $0x60] ss:$16 sps:$4 sm:$0xff]   ;;  %2864 = vmatprep.subr.bf16.mxu0 %v3680_v35  ;;  %v4593_v35 = vld [vmem:[#allocation25_spill] sm:$0xff] }
 0x69e   :  { %2907 = vmatprep.subr.bf16.mxu1 %v4332_v27  ;;  %v3683_v27 = vld [vmem:[#allocation6 + $0x84] ss:$16 sps:$4 sm:$0xff]  }
 0x6a0   :  { %2865 = vmatpush1.bf16.msra.mxu0 %v3678_v44 }
 0x6a1   :  { %2908 = vmatpush1.bf16.msra.mxu1 %v4334_v31  ;;  %v3681_v31 = vld [vmem:[#allocation6 + $0x80] ss:$16 sps:$4 sm:$0xff]   ;;  %2866 = vmatprep.subr.bf16.mxu0 %v3683_v27 }
 0x6a2   :  { %2909 = vmatprep.subr.bf16.mxu1 %v4337_v20  ;;  %v3684_v20 = vld [vmem:[#allocation6 + $0xa0] ss:$16 sps:$4 sm:$0xff]  }
 0x6a4   :  { %2867 = vmatpush1.bf16.msra.mxu0 %v3681_v31 }
 0x6a5   :  { %2910 = vmatpush1.bf16.msra.mxu1 %v4340_v41  ;;  %v3686_v41 = vld [vmem:[#allocation6 + $0xa4] ss:$16 sps:$4 sm:$0xff]  }
 0x6a6   :  { %2911 = vmatprep.subr.bf16.mxu1 %v4343_v9  ;;  %v3689_v9 = vld [vmem:[#allocation6 + $0xc4] ss:$16 sps:$4 sm:$0xff]   ;;  %2868 = vmatprep.subr.bf16.mxu0 %v3686_v41 }
 0x6a8   :  { %2869 = vmatpush1.bf16.msra.mxu0 %v3684_v20  ;;  %v4594_v20 = vld [vmem:[#allocation17_spill] sm:$0xff] }
 0x6a9   :  { %2912 = vmatpush1.bf16.msra.mxu1 %v4346_v10  ;;  %v3687_v10 = vld [vmem:[#allocation6 + $0xc0] ss:$16 sps:$4 sm:$0xff]   ;;  %2870 = vmatprep.subr.bf16.mxu0 %v3689_v9 }
 0x6aa   :  { %2913 = vmatprep.subr.bf16.mxu1 %v4349_v15  ;;  %v3692_v15 = vld [vmem:[#allocation6 + $0xe4] ss:$16 sps:$4 sm:$0xff]  }
 0x6ab   :  { %v4595_v9 = vld [vmem:[#allocation26_spill] sm:$0xff] }
 0x6ac   :  { %2871 = vmatpush1.bf16.msra.mxu0 %v3687_v10 }
 0x6ad   :  { %2914 = vmatpush1.bf16.msra.mxu1 %v4352_v46  ;;  %v3690_v46 = vld [vmem:[#allocation6 + $0xe0] ss:$16 sps:$4 sm:$0xff]   ;;  %2872 = vmatprep.subr.bf16.mxu0 %v3692_v15 }
 0x6b0   :  { %2873 = vmatpush1.bf16.msra.mxu0 %v3690_v46 }
 0x6b1   :  { %3492 = vmatprep.subr.bf16.mxu0 %v3693_v4 }
 0x763   :  { %v2580_v33 = vpop.f32.mrb[24].mxu0  ;;  %v2621_v8 = vpop.f32.mrb[56].mxu1 }
 0x764   :  { %v2628_v13 = vadd.f32 %v2580_v33, %v4588_v11  ;;  %v2630_v18 = vadd.f32 %v2621_v8, %v4589_v14  ;;  %v2582_v17 = vpop.f32.mrb[25].mxu0  ;;  %v2623_v55 = vpop.f32.mrb[57].mxu1 }
 0x765   :  { %v2629_v57 = vadd.f32 %v2582_v17, %v4590_v56  ;;  %v2631_v59 = vadd.f32 %v2623_v55, %v4591_v58  ;;  %v2584_v60 = vpop.f32.mrb[26].mxu0  ;;  %v2625_v61 = vpop.f32.mrb[58].mxu1 }
 0x766   :  { %v3433_v62 = vmul.f32 -1.442695, %v2628_v13  ;;  %v2585_v63 = vpop.f32.mrb[27].mxu0  ;;  %v2626_v1 = vpop.f32.mrb[59].mxu1 }
 0x767   :  { %v3434_v2 = vmul.f32 -1.442695, %v2629_v57  ;;  %v3435_v3 = vmul.f32 -1.442695, %v2631_v59  ;;  %v3471_v59 = vld [vmem:[%s4557_s5] ss:$0 sm:$0xff] }
 0x768   :  { %3797 = vpow2.f32 %v3433_v62 }
 0x769   :  { %3799 = vpow2.f32 %v3434_v2 }
 0x76a   :  { %3801 = vpow2.f32 %v3435_v3 }
 0x76b   :  { %3803 = vtanh.f32 %v2630_v18 }
 0x772   :  { %v3798_v5 = vpop.eup %3797 }
 0x773   :  { %v3800_v6 = vpop.eup %3799  ;;  %v2635_v28 = vadd.f32 1.0, %v3798_v5 }
 0x774   :  { %v2641_v39 = vadd.f32 1.0, %v3800_v6  ;;  %v3802_v43 = vpop.eup %3801 }
 0x775   :  { %3805 = vrcp.f32 %v2635_v28  ;;  %v3804_v32 = vpop.eup %3803  ;;  %v2648_v36 = vadd.f32 1.0, %v3802_v43 }
 0x776   :  { %3807 = vrcp.f32 %v2641_v39 }
 0x777   :  { %3809 = vrcp.f32 %v2648_v36 }
 0x77f   :  { %v3806_v38 = vpop.eup %3805 }
 0x780   :  { %v3808_v45 = vpop.eup %3807  ;;  %v2652_v22 = vmul.f32 %v3806_v38, %v3804_v32 }
 0x781   :  { %v2651_v25 = vmul.f32 %v3808_v45, %v4453_v53  ;;  %v3810_v40 = vpop.eup %3809  ;;  %v3695_v53 = vld [vmem:[%s4556_s4 + $0x10] sm:$0xff]  }
 0x783   :  { %v4485_v47 = vadd.f32 %v2652_v22, %v2651_v25 }
 0x785   :  { %3811 = vtanh.f32 %v4485_v47 }
 0x78f   :  { %v3812_v49 = vpop.eup %3811 }
 0x790   :  { %v4488_v54 = vmul.f32 %v3812_v49, %v3810_v40 }
 0x792   :  { %v2665_v26 = vpack.c.bf16 %v4488_v54, %v4488_v54 }
 0x794   :  { %2891 = vmatmul.mubr.bf16.vlgmr.msra.gmra.mrb[28].mxu0 %v2665_v26  ;;  %2932 = vmatmul.mubr.bf16.vlgmr.msra.gmra.mrb[60].mxu1 %v2665_v26 }
 0x795   :  { %3493 = vmatpush3.bf16.msra.mxu0 %v3693_v4  ;;  %3508 = vmatprep.mubr.bf16.mxu0 %v2978_v30 }
 0x796   :  { %3494 = vmatprep.subr.bf16.mxu0 %v3694_v29 }
 0x799   :  { %3495 = vmatpush3.bf16.msra.mxu0 %v3694_v29 }
 0x79a   :  { %3496 = vmatprep.subr.bf16.mxu0 %v3695_v53 }
 0x79d   :  { %3497 = vmatpush3.bf16.msra.mxu0 %v3695_v53 }
 0x79e   :  { %3498 = vmatprep.subr.bf16.mxu0 %v3696_v24 }
 0x7a1   :  { %3499 = vmatpush3.bf16.msra.mxu0 %v3696_v24 }
 0x7a2   :  { %3500 = vmatprep.subr.bf16.mxu0 %v3697_v48 }
 0x7a5   :  { %3501 = vmatpush3.bf16.msra.mxu0 %v3697_v48 }
 0x7a6   :  { %3502 = vmatprep.subr.bf16.mxu0 %v3698_v19 }
 0x7a9   :  { %3503 = vmatpush3.bf16.msra.mxu0 %v3698_v19 }
 0x7aa   :  { %3504 = vmatprep.subr.bf16.mxu0 %v3699_v50 }
 0x7ad   :  { %3505 = vmatpush3.bf16.msra.mxu0 %v3699_v50 }
 0x7ae   :  { %3506 = vmatprep.subr.bf16.mxu0 %v3700_v51 }
 0x7b1   :  { %3507 = vmatpush3.bf16.msra.mxu0 %v3700_v51 }
 0x7b4   :  { %3509 = vmatmul.mubr.bf16.vlgmr.msra.gmra.mrb[32].mxu0 %v2979_v16 }
 0x7b5   :  { %3512 = vmatprep.mubr.bf16.mxu0 %v2980_v52 }
 0x867   :  { %v2892_v0 = vpop.f32.mrb[28].mxu0  ;;  %v2933_v23 = vpop.f32.mrb[60].mxu1 }
 0x868   :  { %v2940_v12 = vadd.f32 %v2892_v0, %v4592_v42  ;;  %v2942_v44 = vadd.f32 %v2933_v23, %v4593_v35  ;;  %v2894_v27 = vpop.f32.mrb[29].mxu0  ;;  %v2935_v31 = vpop.f32.mrb[61].mxu1 }
 0x869   :  { %v2941_v41 = vadd.f32 %v2894_v27, %v4594_v20  ;;  %v2943_v10 = vadd.f32 %v2935_v31, %v4595_v9  ;;  %v2896_v15 = vpop.f32.mrb[30].mxu0  ;;  %v2937_v46 = vpop.f32.mrb[62].mxu1 }
 0x86a   :  { %v3468_v34 = vmul.f32 -1.442695, %v2940_v12  ;;  %v2897_v7 = vpop.f32.mrb[31].mxu0  ;;  %v2938_v4 = vpop.f32.mrb[63].mxu1 }
 0x86b   :  { %v3469_v21 = vmul.f32 -1.442695, %v2941_v41  ;;  %v3470_v37 = vmul.f32 -1.442695, %v2943_v10 }
 0x86c   :  { %3813 = vpow2.f32 %v3468_v34 }
 0x86d   :  { %3815 = vpow2.f32 %v3469_v21 }
 0x86e   :  { %3817 = vpow2.f32 %v3470_v37 }
 0x86f   :  { %3819 = vtanh.f32 %v2942_v44 }
 0x876   :  { %v3814_v33 = vpop.eup %3813 }
 0x877   :  { %v3816_v8 = vpop.eup %3815  ;;  %v2947_v11 = vadd.f32 1.0, %v3814_v33 }
 0x878   :  { %v2953_v13 = vadd.f32 1.0, %v3816_v8  ;;  %v3818_v14 = vpop.eup %3817 }
 0x879   :  { %3821 = vrcp.f32 %v2947_v11  ;;  %v3820_v18 = vpop.eup %3819  ;;  %v2960_v57 = vadd.f32 1.0, %v3818_v14 }
 0x87a   :  { %3823 = vrcp.f32 %v2953_v13 }
 0x87b   :  { %3825 = vrcp.f32 %v2960_v57 }
 0x883   :  { %v3822_v17 = vpop.eup %3821 }
 0x884   :  { %v3824_v55 = vpop.eup %3823  ;;  %v2964_v56 = vmul.f32 %v3822_v17, %v3820_v18 }
 0x885   :  { %v2963_v58 = vmul.f32 %v3824_v55, %v4485_v47  ;;  %v3826_v25 = vpop.eup %3825 }
 0x887   :  { %v3510_v60 = vpop.f32.mrb[32].mxu0  ;;  %v2965_v61 = vadd.f32 %v2964_v56, %v2963_v58 }
 0x888   :  { %v3096_v62 = vadd.f32 %v3510_v60, %v3471_v59  ;;  %v3087_v63 = vpop.f32.mrb[33].mxu0 }
 0x889   :  { %v3088_v1 = vadd.f32 %v3471_v59, %v3087_v63  ;;  %v3511_v2 = vpop.f32.mrb[34].mxu0  ;;  %3827 = vtanh.f32 %v2965_v61 }
 0x88a   :  { %v3120_v3 = vmax.f32 %v3096_v62, 0.0  ;;  %v3099_v5 = vadd.f32 %v3511_v2, %v3471_v59  ;;  %v3090_v6 = vpop.f32.mrb[35].mxu0 }
 0x88b   :  { %v3118_v28 = vmax.f32 %v3088_v1, 0.0  ;;  %v3091_v39 = vadd.f32 %v3471_v59, %v3090_v6 }
 0x88c   :  { %v3128_v43 = vmin.f32 %v3120_v3, 100.0  ;;  %v3121_v32 = vmax.f32 %v3099_v5, 0.0 }
 0x88d   :  { %v3126_v38 = vmin.f32 %v3118_v28, 100.0  ;;  %v3119_v45 = vmax.f32 %v3091_v39, 0.0 }
 0x88e   :  { %3136 = vst [vmem:[%s4558_s6 + $0x10] sm:$0xff] %v3128_v43  ;;  %v3129_v22 = vmin.f32 %v3121_v32, 100.0 }
 0x88f   :  { %3134 = vst [vmem:[%s4558_s6] sm:$0xff] %v3126_v38  ;;  %v3127_v36 = vmin.f32 %v3119_v45, 100.0 }
 0x890   :  { %3137 = vst [vmem:[%s4558_s6 + $0x18] sm:$0xff] %v3129_v22 }
 0x891   :  { %3135 = vst [vmem:[%s4558_s6 + $0x8] sm:$0xff] %v3127_v36 }
 0x893   :  { %v3828_v47 = vpop.eup %3827 }
 0x894   :  { %v2967_v40 = vmul.f32 %v3828_v47, %v3826_v25 }
 0x896   :  { %v2981_v49 = vpack.c.bf16 %v2967_v40, %v4488_v54 }
 0x898   :  { %3513 = vmatmul.mubr.bf16.gmra.mrb[36].mxu0 %v2981_v49 }
 0x96b   :  { %v3514_v26 = vpop.f32.mrb[36].mxu0 }
 0x96c   :  { %v3112_v29 = vadd.f32 %v3514_v26, %v3471_v59  ;;  %v3103_v30 = vpop.f32.mrb[37].mxu0 }
 0x96d   :  { %v3104_v53 = vadd.f32 %v3471_v59, %v3103_v30  ;;  %v3515_v24 = vpop.f32.mrb[38].mxu0 }
 0x96e   :  { %v3124_v48 = vmax.f32 %v3112_v29, 0.0  ;;  %v3115_v19 = vadd.f32 %v3515_v24, %v3471_v59  ;;  %v3106_v50 = vpop.f32.mrb[39].mxu0 }
 0x96f   :  { %v3122_v51 = vmax.f32 %v3104_v53, 0.0  ;;  %v3107_v16 = vadd.f32 %v3471_v59, %v3106_v50 }
 0x970   :  { %v3132_v52 = vmin.f32 %v3124_v48, 100.0  ;;  %v3125_v0 = vmax.f32 %v3115_v19, 0.0 }
 0x971   :  { %v3130_v23 = vmin.f32 %v3122_v51, 100.0  ;;  %v3123_v42 = vmax.f32 %v3107_v16, 0.0 }
 0x972   :  { %3140 = vst [vmem:[%s4558_s6 + $0x30] sm:$0xff] %v3132_v52  ;;  %v3133_v54 = vmin.f32 %v3125_v0, 100.0 }
 0x973   :  { %3138 = vst [vmem:[%s4558_s6 + $0x20] sm:$0xff] %v3130_v23  ;;  %v3131_v12 = vmin.f32 %v3123_v42, 100.0 }
 0x974   :  { %3141 = vst [vmem:[%s4558_s6 + $0x38] sm:$0xff] %v3133_v54 }
 0x975   :  { %3139 = vst [vmem:[%s4558_s6 + $0x28] sm:$0xff] %v3131_v12 }
 0x976   :  { %3146 = vsyncpa [#allocation5], 1 }
 0x977   :  { %3147 = vsyncpa [#allocation7], 1 }

</bundles_post_ra>
